<compile_context>
chip_gen: v7x
topology: tpu7x:2x2x1
jax: 0.10.0
libtpu: 0.0.40
codegen_flags: <defaults>
</compile_context>

<pallas_src>
import functools

import jax
import jax.numpy as jnp
from jax.experimental import pallas as pl
from jax.experimental.pallas import tpu as pltpu

_SQRT2_INV = 0.7071067811865476
_SQRT_2_OVER_PI = 0.7978845608028654


def _gelu_f32(x, approximate):
    if approximate:
        # tanh approximation: transcendental goes to the (otherwise idle) EUP.
        return 0.5 * x * (1.0 + jnp.tanh(_SQRT_2_OVER_PI * (x + 0.044715 * x * x * x)))
    # torch.nn.GELU() default: 0.5 * x * (1 + erf(x / sqrt(2)))
    return 0.5 * x * (1.0 + jax.lax.erf(x * _SQRT2_INV))


def _mrc_heads_kernel(seq_i_ref, seq_j_ref, wi_ref, bi_ref, w1b_ref, w2_ref, b2_ref,
                      start_ref, end_ref, match_ref, p_scr, q_scr,
                      *, group, chunk, approximate):
    tq, H2 = p_scr.shape
    tk = q_scr.shape[0]
    j = pl.program_id(2)

    # ---- i-side: fused [p | start | end] projection, computed once per (b, i);
    # p is cached in VMEM and reused across the whole key-tile (j) sweep. ----
    @pl.when(j == 0)
    def _():
        xi = seq_i_ref[0]                                                   # [tq, H]
        pfull = (jnp.dot(xi, wi_ref[...], preferred_element_type=jnp.float32)
                 + bi_ref[...])                                             # [tq, 2H+2] f32
        p_scr[...] = pfull[:, :H2].astype(p_scr.dtype)   # = x_i @ W1[:, :H].T + b1
        start_ref[0] = pfull[:, H2:H2 + 1]               # Linear(H, 1) start head
        end_ref[0] = pfull[:, H2 + 1:H2 + 2]             # Linear(H, 1) end head

    # ---- j-side projection slab (bf16 on v6e/v7x, f32 on v5e). ----
    q_scr[...] = jnp.dot(seq_j_ref[0], w1b_ref[...],
                         preferred_element_type=jnp.float32).astype(q_scr.dtype)

    b2 = b2_ref[0]

    # Key rows in static groups of `group`: per row, GELU(p + q[c]) @ w2 is
    # built chunk-by-chunk over 2H (small live slab, chunk consumed by its
    # dot), and the finished 8-column group is written straight into the
    # lane-dense match tile at a static aligned lane offset.  No one-hot
    # scatter, no [tq, tk] accumulator, no extra read-add-write pass.
    for c0 in range(0, tk, group):
        cols = []
        for r in range(group):
            c = c0 + r
            acc = None
            for h0 in range(0, H2, chunk):
                pc = p_scr[:, h0:h0 + chunk]                               # [tq, chunk]
                qc = q_scr[c:c + 1, h0:h0 + chunk]                         # [1, chunk]
                s = (pc + qc).astype(jnp.float32)     # add in compute dtype, GELU in f32
                g = _gelu_f32(s, approximate)
                part = jnp.dot(g, w2_ref[h0:h0 + chunk, :],
                               preferred_element_type=jnp.float32)         # [tq, 1]
                acc = part if acc is None else acc + part
            cols.append(acc)
        match_ref[0, :, c0:c0 + group] = jnp.concatenate(cols, axis=1) + b2


def _padded_bytes(shape, dtype):
    """VMEM footprint of one buffer, honouring (sublane, 128)-tile padding."""
    itemsize = jnp.dtype(dtype).itemsize
    dims = list(shape)
    if not dims:
        return itemsize
    dims[-1] = -(-dims[-1] // 128) * 128
    if len(dims) >= 2:
        sub = {4: 8, 2: 16, 1: 32}.get(itemsize, 8)
        dims[-2] = -(-dims[-2] // sub) * sub
    n = 1
    for d in dims:
        n *= d
    return n * itemsize


def _default_compute_dtype():
    # bf16 slabs/weights only where the VPU handles bf16 natively (v6e/v7x);
    # f32 on v5e and older (no bf16 VALU there, so bf16 is pure cast overhead).
    try:
        kind = jax.devices()[0].device_kind.lower()
    except Exception:
        return jnp.float32
    return jnp.bfloat16 if ("v6" in kind or "v7" in kind) else jnp.float32


def _pick_tile(size, pref):
    for cand in (pref, 256, 128, 64, 32, 16, 8):
        if cand <= size and size % cand == 0:
            return cand
    return size


def mrc_ner_heads(sequence_output, params, *, tq=None, tk=None,
                  compute_dtype=None, approximate_gelu=False):
    """sequence_output: [B, S, H] -> (start [B,S], end [B,S], match [B,S,S])."""
    B, S, H = sequence_output.shape
    H2 = 2 * H
    f32 = jnp.float32
    cdt = _default_compute_dtype() if compute_dtype is None else compute_dtype

    if tq is None:
        tq = _pick_tile(S, 256)   # larger tq => fewer redundant q-slab recomputes
    if tk is None:
        tk = _pick_tile(S, 128)
    assert S % tq == 0 and S % tk == 0, "S must be divisible by the tile sizes"

    # v7x megacore: keep the parallel grid extent B*(S/tq) >= 2 so both
    # TensorCores get work (no effect on single-TC v5e/v6e).
    if B * (S // tq) < 2:
        for cand in (tq // 2, tq // 4):
            if cand >= 8 and S % cand == 0:
                tq = cand
                break

    group = next((g for g in (8, 4, 2, 1) if tk % g == 0), 1)
    if H2 <= 512:
        chunk = H2
    else:
        chunk = next((c for c in (512, 256, 128) if H2 % c == 0), H2)

    # --- weight prep (torch (out, in) layouts -> matmul layouts) ---
    W1 = params["match_w1"].astype(f32)                       # [2H, 2H]
    w1a = W1[:, :H].T                                          # [H, 2H]  multiplies x_i
    w1b = W1[:, H:].T.astype(cdt)                              # [H, 2H]  multiplies x_j
    ws = params["start_w"].astype(f32).T                       # [H, 1]
    we = params["end_w"].astype(f32).T                         # [H, 1]
    # Fused i-side weight: one wide MXU matmul yields [p | start | end].
    wi = jnp.concatenate([w1a, ws, we], axis=1).astype(cdt)    # [H, 2H+2]
    bi = jnp.concatenate([params["match_b1"], params["start_b"],
                          params["end_b"]]).astype(f32).reshape(1, H2 + 2)
    w2 = params["match_w2"].astype(f32).T                      # [2H, 1]  kept f32
    b2 = params["match_b2"].astype(f32).reshape(1)             # (1,) -> SMEM

    seq = sequence_output.astype(cdt)

    kernel = functools.partial(_mrc_heads_kernel, group=group, chunk=chunk,
                               approximate=approximate_gelu)

    out_shape = (jax.ShapeDtypeStruct((B, S, 1), f32),
                 jax.ShapeDtypeStruct((B, S, 1), f32),
                 jax.ShapeDtypeStruct((B, S, S), f32))
    out_specs = (pl.BlockSpec((1, tq, 1), lambda b, i, j: (b, i, 0)),
                 pl.BlockSpec((1, tq, 1), lambda b, i, j: (b, i, 0)),
                 pl.BlockSpec((1, tq, tk), lambda b, i, j: (b, i, j)))  # lane-dense tile
    scratch_shapes = [pltpu.VMEM((tq, H2), cdt),     # p cache (whole j sweep)
                      pltpu.VMEM((tk, H2), cdt)]     # q slab

    # Scoped-VMEM budget with tile padding (incl. 128-lane padding of the
    # (1,tq,1) outputs and the [2H,1] w2 column) plus headroom.  Weights are
    # counted double-buffered so the budget also covers the fallback path.
    need = (2 * _padded_bytes((1, tq, H), cdt)
            + 2 * _padded_bytes((1, tk, H), cdt)
            + 2 * _padded_bytes((H, H2 + 2), cdt)
            + 2 * _padded_bytes((1, H2 + 2), f32)
            + 2 * _padded_bytes((H, H2), cdt)
            + 2 * _padded_bytes((H2, 1), f32)
            + 4 * _padded_bytes((1, tq, 1), f32)
            + 2 * _padded_bytes((1, tq, tk), f32)
            + _padded_bytes((tq, H2), cdt) + _padded_bytes((tk, H2), cdt)
            + _padded_bytes((tq, H2 + 2), f32) + 6 * _padded_bytes((tq, chunk), f32))
    vmem_limit = int(min(max(int(need * 1.25), 32 << 20), 112 << 20))

    def build(single_buffer_weights):
        def const(shape):
            # Constant-index operands: single-buffer them (double-buffering a
            # never-changing block only doubles residency).
            if single_buffer_weights:
                return pl.BlockSpec(shape, lambda b, i, j: (0,) * len(shape),
                                    pipeline_mode=pl.Buffered(1))
            return pl.BlockSpec(shape, lambda b, i, j: (0,) * len(shape))

        in_specs = [
            pl.BlockSpec((1, tq, H), lambda b, i, j: (b, i, 0)),   # x_i tile
            pl.BlockSpec((1, tk, H), lambda b, i, j: (b, j, 0)),   # x_j tile
            const((H, H2 + 2)),                                    # fused i-side weight
            const((1, H2 + 2)),                                    # fused i-side bias
            const((H, H2)),                                        # j-side weight
            const((H2, 1)),                                        # w2 column (f32)
            pl.BlockSpec(memory_space=pltpu.MemorySpace.SMEM),     # b2 scalar
        ]
        return pl.pallas_call(
            kernel,
            grid=(B, S // tq, S // tk),
            in_specs=in_specs,
            out_specs=out_specs,
            out_shape=out_shape,
            scratch_shapes=scratch_shapes,
            compiler_params=pltpu.CompilerParams(
                dimension_semantics=("parallel", "parallel", "arbitrary"),
                vmem_limit_bytes=vmem_limit))

    args = (seq, seq, wi, bi, w1b, w2, b2)
    try:
        start3, end3, match = build(True)(*args)
    except Exception:
        # pipeline_mode / Buffered(1) unsupported on this JAX version:
        # fall back to default double-buffered constants (same kernel body).
        start3, end3, match = build(False)(*args)

    # Glue: squeeze the tiny start/end singleton dims (matches .squeeze(-1)).
    # TODO(synk): lane-dense [B, S] start/end outputs would avoid the squeeze
    # but need a [tq,1]->[1,tq] in-kernel transpose; kept 3-D for safe lowering.
    return start3[..., 0], end3[..., 0], match


def mrc_ner_heads_ref(sequence_output, params):
    """Pure-JAX reference of the three heads (for correctness checking)."""
    x = sequence_output.astype(jnp.float32)
    B, S, H = x.shape
    start = jnp.einsum("bsh,oh->bso", x, params["start_w"])[..., 0] + params["start_b"][0]
    end = jnp.einsum("bsh,oh->bso", x, params["end_w"])[..., 0] + params["end_b"][0]
    a = jnp.broadcast_to(x[:, :, None, :], (B, S, S, H))
    b = jnp.broadcast_to(x[:, None, :, :], (B, S, S, H))
    mm = jnp.concatenate([a, b], axis=-1)
    h = jnp.einsum("bijk,ok->bijo", mm, params["match_w1"]) + params["match_b1"]
    g = _gelu_f32(h, False)
    match = jnp.einsum("bijo,no->bijn", g, params["match_w2"])[..., 0] + params["match_b2"][0]
    return start, end, match


def init_params(key, vocab_size, max_pos, type_vocab, hidden):
    ks = jax.random.split(key, 8)
    n = lambda k, shape: (0.02 * jax.random.normal(k, shape)).astype(jnp.float32)
    H2 = 2 * hidden
    return {
        # BERT embedding stub parameters
        "word_emb": n(ks[0], (vocab_size, hidden)),
        "pos_emb": n(ks[1], (max_pos, hidden)),
        "type_emb": n(ks[2], (type_vocab, hidden)),
        "ln_gamma": jnp.ones((hidden,), jnp.float32),
        "ln_beta": jnp.zeros((hidden,), jnp.float32),
        # start / end classifiers: Linear(hidden, 1)
        "start_w": n(ks[3], (1, hidden)), "start_b": jnp.zeros((1,), jnp.float32),
        "end_w": n(ks[4], (1, hidden)), "end_b": jnp.zeros((1,), jnp.float32),
        # match classifier: Linear(2H, 2H) -> GELU -> Dropout -> Linear(2H, 1)
        "match_w1": n(ks[5], (H2, H2)), "match_b1": jnp.zeros((H2,), jnp.float32),
        "match_w2": n(ks[6], (1, H2)), "match_b2": jnp.zeros((1,), jnp.float32),
    }


def bert_encoder_stub(params, input_ids, attention_mask, token_type_ids):
    # TODO(synk): the pretrained BERT transformer encoder stack has no clean
    # self-contained Pallas equivalent here; it is replaced by its embedding
    # layer (word + position + token-type lookups, LayerNorm) as JAX glue.
    B, S = input_ids.shape
    emb = (params["word_emb"][input_ids]
           + params["pos_emb"][jnp.arange(S)][None, :, :]
           + params["type_emb"][token_type_ids])
    mu = emb.mean(-1, keepdims=True)
    var = ((emb - mu) ** 2).mean(-1, keepdims=True)
    seq = (emb - mu) * jax.lax.rsqrt(var + 1e-12)
    return seq * params["ln_gamma"] + params["ln_beta"]


def mrc_ner_forward(params, input_ids, attention_mask, token_type_ids, sequence_mask):
    sequence_output = bert_encoder_stub(params, input_ids, attention_mask, token_type_ids)
    start_logits, end_logits, match_logits = mrc_ner_heads(sequence_output, params)
    return {
        "start_logits": start_logits,   # [B, S]
        "end_logits": end_logits,       # [B, S]
        "match_logits": match_logits,   # [B, S, S]
        "mask": sequence_mask,          # [B, S]
    }


if __name__ == "__main__":
    B, S, H = 2, 8, 32
    VOCAB, MAX_POS, TYPE_VOCAB = 100, 64, 2

    key = jax.random.PRNGKey(0)
    k_params, k_ids = jax.random.split(key)

    params = init_params(k_params, VOCAB, MAX_POS, TYPE_VOCAB, H)

    input_ids = jax.random.randint(k_ids, (B, S), 0, VOCAB, dtype=jnp.int32)
    attention_mask = jnp.ones((B, S), jnp.int32)
    token_type_ids = jnp.zeros((B, S), jnp.int32)
    sequence_mask = jnp.ones((B, S), jnp.int32)

    out = mrc_ner_forward(params, input_ids, attention_mask, token_type_ids, sequence_mask)
    jax.block_until_ready(out)

    assert out["start_logits"].shape == (B, S)
    assert out["end_logits"].shape == (B, S)
    assert out["match_logits"].shape == (B, S, S)

    # Correctness check against a pure-JAX reference of the heads.
    seq = bert_encoder_stub(params, input_ids, attention_mask, token_type_ids)
    s_ref, e_ref, m_ref = mrc_ner_heads_ref(seq, params)
    if _default_compute_dtype() == jnp.bfloat16:
        atol, rtol = 2e-2, 2e-2   # bf16 slab/weight path (v6e/v7x)
    else:
        atol, rtol = 5e-3, 1e-2   # f32 path (v5e and others)
    assert jnp.allclose(out["start_logits"], s_ref, atol=atol, rtol=rtol)
    assert jnp.allclose(out["end_logits"], e_ref, atol=atol, rtol=rtol)
    assert jnp.allclose(out["match_logits"], m_ref, atol=atol, rtol=rtol)

    print("KERNEL_OK")
</pallas_src>

<mosaic_0001>
module attributes {stable_mosaic.version = 11 : i64} {
  func.func @_mrc_heads_kernel(%arg0: i32, %arg1: i32, %arg2: i32, %arg3: memref<1x8x32xf32, #tpu.memory_space<vmem>>, %arg4: memref<1x8x32xf32, #tpu.memory_space<vmem>>, %arg5: memref<32x66xf32, #tpu.memory_space<vmem>>, %arg6: memref<1x66xf32, #tpu.memory_space<vmem>>, %arg7: memref<32x64xf32, #tpu.memory_space<vmem>>, %arg8: memref<64x1xf32, #tpu.memory_space<vmem>>, %arg9: memref<1xf32, #tpu.memory_space<smem>>, %arg10: memref<1x8x1xf32, #tpu.memory_space<vmem>>, %arg11: memref<1x8x1xf32, #tpu.memory_space<vmem>>, %arg12: memref<1x8x8xf32, #tpu.memory_space<vmem>>, %arg13: memref<8x64xf32, #tpu.memory_space<vmem>>, %arg14: memref<8x64xf32, #tpu.memory_space<vmem>>) attributes {dimension_semantics = [#tpu.dimension_semantics<parallel>, #tpu.dimension_semantics<parallel>, #tpu.dimension_semantics<arbitrary>], iteration_bounds = array<i64: 2, 1, 1>, scalar_prefetch = 0 : i64, scratch_operands = 2 : i64, tpu.core_type = #tpu.core_type<tc>, window_params = [{transform_indices = @transform_0, window_bounds = array<i64: 1, 8, 32>}, {transform_indices = @transform_1, window_bounds = array<i64: 1, 8, 32>}, {pipeline_mode = #tpu.pipeline_mode<synchronous>, transform_indices = @transform_2, window_bounds = array<i64: 32, 66>}, {pipeline_mode = #tpu.pipeline_mode<synchronous>, transform_indices = @transform_3, window_bounds = array<i64: 1, 66>}, {pipeline_mode = #tpu.pipeline_mode<synchronous>, transform_indices = @transform_4, window_bounds = array<i64: 32, 64>}, {pipeline_mode = #tpu.pipeline_mode<synchronous>, transform_indices = @transform_5, window_bounds = array<i64: 64, 1>}, {transform_indices = @transform_6, window_bounds = array<i64: 1>}, {transform_indices = @transform_7, window_bounds = array<i64: 1, 8, 1>}, {transform_indices = @transform_8, window_bounds = array<i64: 1, 8, 1>}, {transform_indices = @transform_9, window_bounds = array<i64: 1, 8, 8>}]} {
    %c0_i32 = arith.constant 0 : i32
    %0 = arith.cmpi eq, %arg2, %c0_i32 : i32
    %1 = arith.extui %0 : i1 to i32
    %c0_i32_0 = arith.constant 0 : i32
    %2 = arith.cmpi ne, %1, %c0_i32_0 : i32
    scf.if %2 {
      %c0_84 = arith.constant 0 : index
      %c0_85 = arith.constant 0 : index
      %c0_86 = arith.constant 0 : index
      %127 = vector.load %arg3[%c0_84, %c0_85, %c0_86] : memref<1x8x32xf32, #tpu.memory_space<vmem>>, vector<1x8x32xf32>
      %128 = vector.shape_cast %127 : vector<1x8x32xf32> to vector<8x32xf32>
      %c0_87 = arith.constant 0 : index
      %c0_88 = arith.constant 0 : index
      %129 = vector.load %arg5[%c0_87, %c0_88] : memref<32x66xf32, #tpu.memory_space<vmem>>, vector<32x66xf32>
      %cst_89 = arith.constant dense<0.000000e+00> : vector<8x66xf32>
      %130 = tpu.matmul %128, %129, %cst_89 {dimension_numbers = #tpu.dot_dimension_numbers<[1], [0], [0], [1], [0, 0, 1, 1], [], []>} : vector<8x32xf32>, vector<32x66xf32>, vector<8x66xf32> -> vector<8x66xf32>
      %c0_90 = arith.constant 0 : index
      %c0_91 = arith.constant 0 : index
      %131 = vector.load %arg6[%c0_90, %c0_91] : memref<1x66xf32, #tpu.memory_space<vmem>>, vector<1x66xf32>
      %132 = vector.broadcast %131 : vector<1x66xf32> to vector<8x66xf32>
      %133 = arith.addf %130, %132 : vector<8x66xf32>
      %134 = vector.extract_strided_slice %133 {offsets = [0, 0], sizes = [8, 64], strides = [1, 1]} : vector<8x66xf32> to vector<8x64xf32>
      %c0_92 = arith.constant 0 : index
      %c0_93 = arith.constant 0 : index
      %135 = vector.load %arg13[%c0_92, %c0_93] : memref<8x64xf32, #tpu.memory_space<vmem>>, vector<8x64xf32>
      tpu.vector_store %arg13[%c0_92, %c0_93], %134 {strides = array<i32>} : memref<8x64xf32, #tpu.memory_space<vmem>>, vector<8x64xf32>,
      %136 = vector.extract_strided_slice %133 {offsets = [0, 64], sizes = [8, 1], strides = [1, 1]} : vector<8x66xf32> to vector<8x1xf32>
      %c0_94 = arith.constant 0 : index
      %c0_95 = arith.constant 0 : index
      %c0_96 = arith.constant 0 : index
      %137 = vector.load %arg10[%c0_94, %c0_95, %c0_96] : memref<1x8x1xf32, #tpu.memory_space<vmem>>, vector<1x8x1xf32>
      %138 = vector.shape_cast %137 : vector<1x8x1xf32> to vector<8x1xf32>
      %139 = vector.shape_cast %136 : vector<8x1xf32> to vector<1x8x1xf32>
      tpu.vector_store %arg10[%c0_94, %c0_95, %c0_96], %139 {strides = array<i32>} : memref<1x8x1xf32, #tpu.memory_space<vmem>>, vector<1x8x1xf32>,
      %140 = vector.extract_strided_slice %133 {offsets = [0, 65], sizes = [8, 1], strides = [1, 1]} : vector<8x66xf32> to vector<8x1xf32>
      %c0_97 = arith.constant 0 : index
      %c0_98 = arith.constant 0 : index
      %c0_99 = arith.constant 0 : index
      %141 = vector.load %arg11[%c0_97, %c0_98, %c0_99] : memref<1x8x1xf32, #tpu.memory_space<vmem>>, vector<1x8x1xf32>
      %142 = vector.shape_cast %141 : vector<1x8x1xf32> to vector<8x1xf32>
      %143 = vector.shape_cast %140 : vector<8x1xf32> to vector<1x8x1xf32>
      tpu.vector_store %arg11[%c0_97, %c0_98, %c0_99], %143 {strides = array<i32>} : memref<1x8x1xf32, #tpu.memory_space<vmem>>, vector<1x8x1xf32>,
    } else {
    }
    %c0 = arith.constant 0 : index
    %c0_1 = arith.constant 0 : index
    %c0_2 = arith.constant 0 : index
    %3 = vector.load %arg4[%c0, %c0_1, %c0_2] : memref<1x8x32xf32, #tpu.memory_space<vmem>>, vector<1x8x32xf32>
    %4 = vector.shape_cast %3 : vector<1x8x32xf32> to vector<8x32xf32>
    %c0_3 = arith.constant 0 : index
    %c0_4 = arith.constant 0 : index
    %5 = vector.load %arg7[%c0_3, %c0_4] : memref<32x64xf32, #tpu.memory_space<vmem>>, vector<32x64xf32>
    %cst = arith.constant dense<0.000000e+00> : vector<8x64xf32>
    %6 = tpu.matmul %4, %5, %cst {dimension_numbers = #tpu.dot_dimension_numbers<[1], [0], [0], [1], [0, 0, 1, 1], [], []>} : vector<8x32xf32>, vector<32x64xf32>, vector<8x64xf32> -> vector<8x64xf32>
    %c0_5 = arith.constant 0 : index
    %c0_6 = arith.constant 0 : index
    %7 = vector.load %arg14[%c0_5, %c0_6] : memref<8x64xf32, #tpu.memory_space<vmem>>, vector<8x64xf32>
    tpu.vector_store %arg14[%c0_5, %c0_6], %6 {strides = array<i32>} : memref<8x64xf32, #tpu.memory_space<vmem>>, vector<8x64xf32>,
    %c0_7 = arith.constant 0 : index
    %8 = memref.load %arg9[%c0_7] : memref<1xf32, #tpu.memory_space<smem>>
    %c0_8 = arith.constant 0 : index
    %c0_9 = arith.constant 0 : index
    %9 = vector.load %arg13[%c0_8, %c0_9] : memref<8x64xf32, #tpu.memory_space<vmem>>, vector<8x64xf32>
    %c0_10 = arith.constant 0 : index
    %c0_11 = arith.constant 0 : index
    %10 = vector.load %arg14[%c0_10, %c0_11] : memref<8x64xf32, #tpu.memory_space<vmem>>, vector<1x64xf32>
    %11 = vector.broadcast %10 : vector<1x64xf32> to vector<8x64xf32>
    %12 = arith.addf %9, %11 : vector<8x64xf32>
    %cst_12 = arith.constant 5.000000e-01 : f32
    %13 = vector.broadcast %cst_12 : f32 to vector<8x64xf32>
    %14 = arith.mulf %13, %12 : vector<8x64xf32>
    %cst_13 = arith.constant 0.707106769 : f32
    %15 = vector.broadcast %cst_13 : f32 to vector<8x64xf32>
    %16 = arith.mulf %12, %15 : vector<8x64xf32>
    %17 = math.erf %16 : vector<8x64xf32>
    %cst_14 = arith.constant 1.000000e+00 : f32
    %18 = vector.broadcast %cst_14 : f32 to vector<8x64xf32>
    %19 = arith.addf %18, %17 : vector<8x64xf32>
    %20 = arith.mulf %14, %19 : vector<8x64xf32>
    %c0_15 = arith.constant 0 : index
    %c0_16 = arith.constant 0 : index
    %21 = vector.load %arg8[%c0_15, %c0_16] : memref<64x1xf32, #tpu.memory_space<vmem>>, vector<64x1xf32>
    %cst_17 = arith.constant dense<0.000000e+00> : vector<8x1xf32>
    %22 = tpu.matmul %20, %21, %cst_17 {dimension_numbers = #tpu.dot_dimension_numbers<[1], [0], [0], [1], [0, 0, 1, 1], [], []>} : vector<8x64xf32>, vector<64x1xf32>, vector<8x1xf32> -> vector<8x1xf32>
    %c0_18 = arith.constant 0 : index
    %c0_19 = arith.constant 0 : index
    %23 = vector.load %arg13[%c0_18, %c0_19] : memref<8x64xf32, #tpu.memory_space<vmem>>, vector<8x64xf32>
    %c1 = arith.constant 1 : index
    %c0_20 = arith.constant 0 : index
    %24 = vector.load %arg14[%c1, %c0_20] : memref<8x64xf32, #tpu.memory_space<vmem>>, vector<1x64xf32>
    %25 = vector.broadcast %24 : vector<1x64xf32> to vector<8x64xf32>
    %26 = arith.addf %23, %25 : vector<8x64xf32>
    %cst_21 = arith.constant 5.000000e-01 : f32
    %27 = vector.broadcast %cst_21 : f32 to vector<8x64xf32>
    %28 = arith.mulf %27, %26 : vector<8x64xf32>
    %cst_22 = arith.constant 0.707106769 : f32
    %29 = vector.broadcast %cst_22 : f32 to vector<8x64xf32>
    %30 = arith.mulf %26, %29 : vector<8x64xf32>
    %31 = math.erf %30 : vector<8x64xf32>
    %cst_23 = arith.constant 1.000000e+00 : f32
    %32 = vector.broadcast %cst_23 : f32 to vector<8x64xf32>
    %33 = arith.addf %32, %31 : vector<8x64xf32>
    %34 = arith.mulf %28, %33 : vector<8x64xf32>
    %c0_24 = arith.constant 0 : index
    %c0_25 = arith.constant 0 : index
    %35 = vector.load %arg8[%c0_24, %c0_25] : memref<64x1xf32, #tpu.memory_space<vmem>>, vector<64x1xf32>
    %cst_26 = arith.constant dense<0.000000e+00> : vector<8x1xf32>
    %36 = tpu.matmul %34, %35, %cst_26 {dimension_numbers = #tpu.dot_dimension_numbers<[1], [0], [0], [1], [0, 0, 1, 1], [], []>} : vector<8x64xf32>, vector<64x1xf32>, vector<8x1xf32> -> vector<8x1xf32>
    %c0_27 = arith.constant 0 : index
    %c0_28 = arith.constant 0 : index
    %37 = vector.load %arg13[%c0_27, %c0_28] : memref<8x64xf32, #tpu.memory_space<vmem>>, vector<8x64xf32>
    %c2 = arith.constant 2 : index
    %c0_29 = arith.constant 0 : index
    %38 = vector.load %arg14[%c2, %c0_29] : memref<8x64xf32, #tpu.memory_space<vmem>>, vector<1x64xf32>
    %39 = vector.broadcast %38 : vector<1x64xf32> to vector<8x64xf32>
    %40 = arith.addf %37, %39 : vector<8x64xf32>
    %cst_30 = arith.constant 5.000000e-01 : f32
    %41 = vector.broadcast %cst_30 : f32 to vector<8x64xf32>
    %42 = arith.mulf %41, %40 : vector<8x64xf32>
    %cst_31 = arith.constant 0.707106769 : f32
    %43 = vector.broadcast %cst_31 : f32 to vector<8x64xf32>
    %44 = arith.mulf %40, %43 : vector<8x64xf32>
    %45 = math.erf %44 : vector<8x64xf32>
    %cst_32 = arith.constant 1.000000e+00 : f32
    %46 = vector.broadcast %cst_32 : f32 to vector<8x64xf32>
    %47 = arith.addf %46, %45 : vector<8x64xf32>
    %48 = arith.mulf %42, %47 : vector<8x64xf32>
    %c0_33 = arith.constant 0 : index
    %c0_34 = arith.constant 0 : index
    %49 = vector.load %arg8[%c0_33, %c0_34] : memref<64x1xf32, #tpu.memory_space<vmem>>, vector<64x1xf32>
    %cst_35 = arith.constant dense<0.000000e+00> : vector<8x1xf32>
    %50 = tpu.matmul %48, %49, %cst_35 {dimension_numbers = #tpu.dot_dimension_numbers<[1], [0], [0], [1], [0, 0, 1, 1], [], []>} : vector<8x64xf32>, vector<64x1xf32>, vector<8x1xf32> -> vector<8x1xf32>
    %c0_36 = arith.constant 0 : index
    %c0_37 = arith.constant 0 : index
    %51 = vector.load %arg13[%c0_36, %c0_37] : memref<8x64xf32, #tpu.memory_space<vmem>>, vector<8x64xf32>
    %c3 = arith.constant 3 : index
    %c0_38 = arith.constant 0 : index
    %52 = vector.load %arg14[%c3, %c0_38] : memref<8x64xf32, #tpu.memory_space<vmem>>, vector<1x64xf32>
    %53 = vector.broadcast %52 : vector<1x64xf32> to vector<8x64xf32>
    %54 = arith.addf %51, %53 : vector<8x64xf32>
    %cst_39 = arith.constant 5.000000e-01 : f32
    %55 = vector.broadcast %cst_39 : f32 to vector<8x64xf32>
    %56 = arith.mulf %55, %54 : vector<8x64xf32>
    %cst_40 = arith.constant 0.707106769 : f32
    %57 = vector.broadcast %cst_40 : f32 to vector<8x64xf32>
    %58 = arith.mulf %54, %57 : vector<8x64xf32>
    %59 = math.erf %58 : vector<8x64xf32>
    %cst_41 = arith.constant 1.000000e+00 : f32
    %60 = vector.broadcast %cst_41 : f32 to vector<8x64xf32>
    %61 = arith.addf %60, %59 : vector<8x64xf32>
    %62 = arith.mulf %56, %61 : vector<8x64xf32>
    %c0_42 = arith.constant 0 : index
    %c0_43 = arith.constant 0 : index
    %63 = vector.load %arg8[%c0_42, %c0_43] : memref<64x1xf32, #tpu.memory_space<vmem>>, vector<64x1xf32>
    %cst_44 = arith.constant dense<0.000000e+00> : vector<8x1xf32>
    %64 = tpu.matmul %62, %63, %cst_44 {dimension_numbers = #tpu.dot_dimension_numbers<[1], [0], [0], [1], [0, 0, 1, 1], [], []>} : vector<8x64xf32>, vector<64x1xf32>, vector<8x1xf32> -> vector<8x1xf32>
    %c0_45 = arith.constant 0 : index
    %c0_46 = arith.constant 0 : index
    %65 = vector.load %arg13[%c0_45, %c0_46] : memref<8x64xf32, #tpu.memory_space<vmem>>, vector<8x64xf32>
    %c4 = arith.constant 4 : index
    %c0_47 = arith.constant 0 : index
    %66 = vector.load %arg14[%c4, %c0_47] : memref<8x64xf32, #tpu.memory_space<vmem>>, vector<1x64xf32>
    %67 = vector.broadcast %66 : vector<1x64xf32> to vector<8x64xf32>
    %68 = arith.addf %65, %67 : vector<8x64xf32>
    %cst_48 = arith.constant 5.000000e-01 : f32
    %69 = vector.broadcast %cst_48 : f32 to vector<8x64xf32>
    %70 = arith.mulf %69, %68 : vector<8x64xf32>
    %cst_49 = arith.constant 0.707106769 : f32
    %71 = vector.broadcast %cst_49 : f32 to vector<8x64xf32>
    %72 = arith.mulf %68, %71 : vector<8x64xf32>
    %73 = math.erf %72 : vector<8x64xf32>
    %cst_50 = arith.constant 1.000000e+00 : f32
    %74 = vector.broadcast %cst_50 : f32 to vector<8x64xf32>
    %75 = arith.addf %74, %73 : vector<8x64xf32>
    %76 = arith.mulf %70, %75 : vector<8x64xf32>
    %c0_51 = arith.constant 0 : index
    %c0_52 = arith.constant 0 : index
    %77 = vector.load %arg8[%c0_51, %c0_52] : memref<64x1xf32, #tpu.memory_space<vmem>>, vector<64x1xf32>
    %cst_53 = arith.constant dense<0.000000e+00> : vector<8x1xf32>
    %78 = tpu.matmul %76, %77, %cst_53 {dimension_numbers = #tpu.dot_dimension_numbers<[1], [0], [0], [1], [0, 0, 1, 1], [], []>} : vector<8x64xf32>, vector<64x1xf32>, vector<8x1xf32> -> vector<8x1xf32>
    %c0_54 = arith.constant 0 : index
    %c0_55 = arith.constant 0 : index
    %79 = vector.load %arg13[%c0_54, %c0_55] : memref<8x64xf32, #tpu.memory_space<vmem>>, vector<8x64xf32>
    %c5 = arith.constant 5 : index
    %c0_56 = arith.constant 0 : index
    %80 = vector.load %arg14[%c5, %c0_56] : memref<8x64xf32, #tpu.memory_space<vmem>>, vector<1x64xf32>
    %81 = vector.broadcast %80 : vector<1x64xf32> to vector<8x64xf32>
    %82 = arith.addf %79, %81 : vector<8x64xf32>
    %cst_57 = arith.constant 5.000000e-01 : f32
    %83 = vector.broadcast %cst_57 : f32 to vector<8x64xf32>
    %84 = arith.mulf %83, %82 : vector<8x64xf32>
    %cst_58 = arith.constant 0.707106769 : f32
    %85 = vector.broadcast %cst_58 : f32 to vector<8x64xf32>
    %86 = arith.mulf %82, %85 : vector<8x64xf32>
    %87 = math.erf %86 : vector<8x64xf32>
    %cst_59 = arith.constant 1.000000e+00 : f32
    %88 = vector.broadcast %cst_59 : f32 to vector<8x64xf32>
    %89 = arith.addf %88, %87 : vector<8x64xf32>
    %90 = arith.mulf %84, %89 : vector<8x64xf32>
    %c0_60 = arith.constant 0 : index
    %c0_61 = arith.constant 0 : index
    %91 = vector.load %arg8[%c0_60, %c0_61] : memref<64x1xf32, #tpu.memory_space<vmem>>, vector<64x1xf32>
    %cst_62 = arith.constant dense<0.000000e+00> : vector<8x1xf32>
    %92 = tpu.matmul %90, %91, %cst_62 {dimension_numbers = #tpu.dot_dimension_numbers<[1], [0], [0], [1], [0, 0, 1, 1], [], []>} : vector<8x64xf32>, vector<64x1xf32>, vector<8x1xf32> -> vector<8x1xf32>
    %c0_63 = arith.constant 0 : index
    %c0_64 = arith.constant 0 : index
    %93 = vector.load %arg13[%c0_63, %c0_64] : memref<8x64xf32, #tpu.memory_space<vmem>>, vector<8x64xf32>
    %c6 = arith.constant 6 : index
    %c0_65 = arith.constant 0 : index
    %94 = vector.load %arg14[%c6, %c0_65] : memref<8x64xf32, #tpu.memory_space<vmem>>, vector<1x64xf32>
    %95 = vector.broadcast %94 : vector<1x64xf32> to vector<8x64xf32>
    %96 = arith.addf %93, %95 : vector<8x64xf32>
    %cst_66 = arith.constant 5.000000e-01 : f32
    %97 = vector.broadcast %cst_66 : f32 to vector<8x64xf32>
    %98 = arith.mulf %97, %96 : vector<8x64xf32>
    %cst_67 = arith.constant 0.707106769 : f32
    %99 = vector.broadcast %cst_67 : f32 to vector<8x64xf32>
    %100 = arith.mulf %96, %99 : vector<8x64xf32>
    %101 = math.erf %100 : vector<8x64xf32>
    %cst_68 = arith.constant 1.000000e+00 : f32
    %102 = vector.broadcast %cst_68 : f32 to vector<8x64xf32>
    %103 = arith.addf %102, %101 : vector<8x64xf32>
    %104 = arith.mulf %98, %103 : vector<8x64xf32>
    %c0_69 = arith.constant 0 : index
    %c0_70 = arith.constant 0 : index
    %105 = vector.load %arg8[%c0_69, %c0_70] : memref<64x1xf32, #tpu.memory_space<vmem>>, vector<64x1xf32>
    %cst_71 = arith.constant dense<0.000000e+00> : vector<8x1xf32>
    %106 = tpu.matmul %104, %105, %cst_71 {dimension_numbers = #tpu.dot_dimension_numbers<[1], [0], [0], [1], [0, 0, 1, 1], [], []>} : vector<8x64xf32>, vector<64x1xf32>, vector<8x1xf32> -> vector<8x1xf32>
    %c0_72 = arith.constant 0 : index
    %c0_73 = arith.constant 0 : index
    %107 = vector.load %arg13[%c0_72, %c0_73] : memref<8x64xf32, #tpu.memory_space<vmem>>, vector<8x64xf32>
    %c7 = arith.constant 7 : index
    %c0_74 = arith.constant 0 : index
    %108 = vector.load %arg14[%c7, %c0_74] : memref<8x64xf32, #tpu.memory_space<vmem>>, vector<1x64xf32>
    %109 = vector.broadcast %108 : vector<1x64xf32> to vector<8x64xf32>
    %110 = arith.addf %107, %109 : vector<8x64xf32>
    %cst_75 = arith.constant 5.000000e-01 : f32
    %111 = vector.broadcast %cst_75 : f32 to vector<8x64xf32>
    %112 = arith.mulf %111, %110 : vector<8x64xf32>
    %cst_76 = arith.constant 0.707106769 : f32
    %113 = vector.broadcast %cst_76 : f32 to vector<8x64xf32>
    %114 = arith.mulf %110, %113 : vector<8x64xf32>
    %115 = math.erf %114 : vector<8x64xf32>
    %cst_77 = arith.constant 1.000000e+00 : f32
    %116 = vector.broadcast %cst_77 : f32 to vector<8x64xf32>
    %117 = arith.addf %116, %115 : vector<8x64xf32>
    %118 = arith.mulf %112, %117 : vector<8x64xf32>
    %c0_78 = arith.constant 0 : index
    %c0_79 = arith.constant 0 : index
    %119 = vector.load %arg8[%c0_78, %c0_79] : memref<64x1xf32, #tpu.memory_space<vmem>>, vector<64x1xf32>
    %cst_80 = arith.constant dense<0.000000e+00> : vector<8x1xf32>
    %120 = tpu.matmul %118, %119, %cst_80 {dimension_numbers = #tpu.dot_dimension_numbers<[1], [0], [0], [1], [0, 0, 1, 1], [], []>} : vector<8x64xf32>, vector<64x1xf32>, vector<8x1xf32> -> vector<8x1xf32>
    %121 = tpu.concatenate %22, %36, %50, %64, %78, %92, %106, %120 in 1 : vector<8x1xf32>, vector<8x1xf32>, vector<8x1xf32>, vector<8x1xf32>, vector<8x1xf32>, vector<8x1xf32>, vector<8x1xf32>, vector<8x1xf32> -> vector<8x8xf32>
    %122 = vector.broadcast %8 : f32 to vector<8x8xf32>
    %123 = arith.addf %121, %122 : vector<8x8xf32>
    %c0_81 = arith.constant 0 : index
    %c0_82 = arith.constant 0 : index
    %c0_83 = arith.constant 0 : index
    %124 = vector.load %arg12[%c0_81, %c0_82, %c0_83] : memref<1x8x8xf32, #tpu.memory_space<vmem>>, vector<1x8x8xf32>
    %125 = vector.shape_cast %124 : vector<1x8x8xf32> to vector<8x8xf32>
    %126 = vector.shape_cast %123 : vector<8x8xf32> to vector<1x8x8xf32>
    tpu.vector_store %arg12[%c0_81, %c0_82, %c0_83], %126 {strides = array<i32>} : memref<1x8x8xf32, #tpu.memory_space<vmem>>, vector<1x8x8xf32>,
    return
  }
  func.func @transform_0(%arg0: i32, %arg1: i32, %arg2: i32) -> (i32, i32, i32) {
    %c0_i32 = arith.constant 0 : i32
    %c0_i32_0 = arith.constant 0 : i32
    return %arg0, %arg1, %c0_i32 : i32, i32, i32
  }
  func.func @transform_1(%arg0: i32, %arg1: i32, %arg2: i32) -> (i32, i32, i32) {
    %c0_i32 = arith.constant 0 : i32
    %c0_i32_0 = arith.constant 0 : i32
    return %arg0, %arg2, %c0_i32 : i32, i32, i32
  }
  func.func @transform_2(%arg0: i32, %arg1: i32, %arg2: i32) -> (i32, i32) {
    %c0_i32 = arith.constant 0 : i32
    %c0_i32_0 = arith.constant 0 : i32
    %c0_i32_1 = arith.constant 0 : i32
    return %c0_i32, %c0_i32_0 : i32, i32
  }
  func.func @transform_3(%arg0: i32, %arg1: i32, %arg2: i32) -> (i32, i32) {
    %c0_i32 = arith.constant 0 : i32
    %c0_i32_0 = arith.constant 0 : i32
    %c0_i32_1 = arith.constant 0 : i32
    return %c0_i32, %c0_i32_0 : i32, i32
  }
  func.func @transform_4(%arg0: i32, %arg1: i32, %arg2: i32) -> (i32, i32) {
    %c0_i32 = arith.constant 0 : i32
    %c0_i32_0 = arith.constant 0 : i32
    %c0_i32_1 = arith.constant 0 : i32
    return %c0_i32, %c0_i32_0 : i32, i32
  }
  func.func @transform_5(%arg0: i32, %arg1: i32, %arg2: i32) -> (i32, i32) {
    %c0_i32 = arith.constant 0 : i32
    %c0_i32_0 = arith.constant 0 : i32
    %c0_i32_1 = arith.constant 0 : i32
    return %c0_i32, %c0_i32_0 : i32, i32
  }
  func.func @transform_6(%arg0: i32, %arg1: i32, %arg2: i32) -> i32 {
    %c0_i32 = arith.constant 0 : i32
    %c0_i32_0 = arith.constant 0 : i32
    return %c0_i32 : i32
  }
  func.func @transform_7(%arg0: i32, %arg1: i32, %arg2: i32) -> (i32, i32, i32) {
    %c0_i32 = arith.constant 0 : i32
    %c0_i32_0 = arith.constant 0 : i32
    return %arg0, %arg1, %c0_i32 : i32, i32, i32
  }
  func.func @transform_8(%arg0: i32, %arg1: i32, %arg2: i32) -> (i32, i32, i32) {
    %c0_i32 = arith.constant 0 : i32
    %c0_i32_0 = arith.constant 0 : i32
    return %arg0, %arg1, %c0_i32 : i32, i32, i32
  }
  func.func @transform_9(%arg0: i32, %arg1: i32, %arg2: i32) -> (i32, i32, i32) {
    %c0_i32 = arith.constant 0 : i32
    return %arg0, %arg1, %arg2 : i32, i32, i32
  }
}

module attributes {stable_mosaic.version = 11 : i64} {
  func.func @_mrc_heads_kernel(%arg0: i32, %arg1: i32, %arg2: i32, %arg3: memref<1x8x32xf32, #tpu.memory_space<vmem>>, %arg4: memref<1x8x32xf32, #tpu.memory_space<vmem>>, %arg5: memref<32x66xf32, #tpu.memory_space<vmem>>, %arg6: memref<1x66xf32, #tpu.memory_space<vmem>>, %arg7: memref<32x64xf32, #tpu.memory_space<vmem>>, %arg8: memref<64x1xf32, #tpu.memory_space<vmem>>, %arg9: memref<1xf32, #tpu.memory_space<smem>>, %arg10: memref<1x8x1xf32, #tpu.memory_space<vmem>>, %arg11: memref<1x8x1xf32, #tpu.memory_space<vmem>>, %arg12: memref<1x8x8xf32, #tpu.memory_space<vmem>>, %arg13: memref<8x64xf32, #tpu.memory_space<vmem>>, %arg14: memref<8x64xf32, #tpu.memory_space<vmem>>) attributes {dimension_semantics = [#tpu.dimension_semantics<parallel>, #tpu.dimension_semantics<parallel>, #tpu.dimension_semantics<arbitrary>], iteration_bounds = array<i64: 2, 1, 1>, scalar_prefetch = 0 : i64, scratch_operands = 2 : i64, tpu.core_type = #tpu.core_type<tc>, window_params = [{transform_indices = @transform_0, window_bounds = array<i64: 1, 8, 32>}, {transform_indices = @transform_1, window_bounds = array<i64: 1, 8, 32>}, {pipeline_mode = #tpu.pipeline_mode<synchronous>, transform_indices = @transform_2, window_bounds = array<i64: 32, 66>}, {pipeline_mode = #tpu.pipeline_mode<synchronous>, transform_indices = @transform_3, window_bounds = array<i64: 1, 66>}, {pipeline_mode = #tpu.pipeline_mode<synchronous>, transform_indices = @transform_4, window_bounds = array<i64: 32, 64>}, {pipeline_mode = #tpu.pipeline_mode<synchronous>, transform_indices = @transform_5, window_bounds = array<i64: 64, 1>}, {transform_indices = @transform_6, window_bounds = array<i64: 1>}, {transform_indices = @transform_7, window_bounds = array<i64: 1, 8, 1>}, {transform_indices = @transform_8, window_bounds = array<i64: 1, 8, 1>}, {transform_indices = @transform_9, window_bounds = array<i64: 1, 8, 8>}]} {
    %c0_i32 = arith.constant 0 : i32
    %0 = arith.cmpi eq, %arg2, %c0_i32 : i32
    %1 = arith.extui %0 : i1 to i32
    %c0_i32_0 = arith.constant 0 : i32
    %2 = arith.cmpi ne, %1, %c0_i32_0 : i32
    scf.if %2 {
      %c0_84 = arith.constant 0 : index
      %c0_85 = arith.constant 0 : index
      %c0_86 = arith.constant 0 : index
      %127 = vector.load %arg3[%c0_84, %c0_85, %c0_86] : memref<1x8x32xf32, #tpu.memory_space<vmem>>, vector<1x8x32xf32>
      %128 = vector.shape_cast %127 : vector<1x8x32xf32> to vector<8x32xf32>
      %c0_87 = arith.constant 0 : index
      %c0_88 = arith.constant 0 : index
      %129 = vector.load %arg5[%c0_87, %c0_88] : memref<32x66xf32, #tpu.memory_space<vmem>>, vector<32x66xf32>
      %cst_89 = arith.constant dense<0.000000e+00> : vector<8x66xf32>
      %130 = tpu.matmul %128, %129, %cst_89 {dimension_numbers = #tpu.dot_dimension_numbers<[1], [0], [0], [1], [0, 0, 1, 1], [], []>} : vector<8x32xf32>, vector<32x66xf32>, vector<8x66xf32> -> vector<8x66xf32>
      %c0_90 = arith.constant 0 : index
      %c0_91 = arith.constant 0 : index
      %131 = vector.load %arg6[%c0_90, %c0_91] : memref<1x66xf32, #tpu.memory_space<vmem>>, vector<1x66xf32>
      %132 = vector.broadcast %131 : vector<1x66xf32> to vector<8x66xf32>
      %133 = arith.addf %130, %132 : vector<8x66xf32>
      %134 = vector.extract_strided_slice %133 {offsets = [0, 0], sizes = [8, 64], strides = [1, 1]} : vector<8x66xf32> to vector<8x64xf32>
      %c0_92 = arith.constant 0 : index
      %c0_93 = arith.constant 0 : index
      %135 = vector.load %arg13[%c0_92, %c0_93] : memref<8x64xf32, #tpu.memory_space<vmem>>, vector<8x64xf32>
      tpu.vector_store %arg13[%c0_92, %c0_93], %134 {strides = array<i32>} : memref<8x64xf32, #tpu.memory_space<vmem>>, vector<8x64xf32>,
      %136 = vector.extract_strided_slice %133 {offsets = [0, 64], sizes = [8, 1], strides = [1, 1]} : vector<8x66xf32> to vector<8x1xf32>
      %c0_94 = arith.constant 0 : index
      %c0_95 = arith.constant 0 : index
      %c0_96 = arith.constant 0 : index
      %137 = vector.load %arg10[%c0_94, %c0_95, %c0_96] : memref<1x8x1xf32, #tpu.memory_space<vmem>>, vector<1x8x1xf32>
      %138 = vector.shape_cast %137 : vector<1x8x1xf32> to vector<8x1xf32>
      %139 = vector.shape_cast %136 : vector<8x1xf32> to vector<1x8x1xf32>
      tpu.vector_store %arg10[%c0_94, %c0_95, %c0_96], %139 {strides = array<i32>} : memref<1x8x1xf32, #tpu.memory_space<vmem>>, vector<1x8x1xf32>,
      %140 = vector.extract_strided_slice %133 {offsets = [0, 65], sizes = [8, 1], strides = [1, 1]} : vector<8x66xf32> to vector<8x1xf32>
      %c0_97 = arith.constant 0 : index
      %c0_98 = arith.constant 0 : index
      %c0_99 = arith.constant 0 : index
      %141 = vector.load %arg11[%c0_97, %c0_98, %c0_99] : memref<1x8x1xf32, #tpu.memory_space<vmem>>, vector<1x8x1xf32>
      %142 = vector.shape_cast %141 : vector<1x8x1xf32> to vector<8x1xf32>
      %143 = vector.shape_cast %140 : vector<8x1xf32> to vector<1x8x1xf32>
      tpu.vector_store %arg11[%c0_97, %c0_98, %c0_99], %143 {strides = array<i32>} : memref<1x8x1xf32, #tpu.memory_space<vmem>>, vector<1x8x1xf32>,
    } else {
    }
    %c0 = arith.constant 0 : index
    %c0_1 = arith.constant 0 : index
    %c0_2 = arith.constant 0 : index
    %3 = vector.load %arg4[%c0, %c0_1, %c0_2] : memref<1x8x32xf32, #tpu.memory_space<vmem>>, vector<1x8x32xf32>
    %4 = vector.shape_cast %3 : vector<1x8x32xf32> to vector<8x32xf32>
    %c0_3 = arith.constant 0 : index
    %c0_4 = arith.constant 0 : index
    %5 = vector.load %arg7[%c0_3, %c0_4] : memref<32x64xf32, #tpu.memory_space<vmem>>, vector<32x64xf32>
    %cst = arith.constant dense<0.000000e+00> : vector<8x64xf32>
    %6 = tpu.matmul %4, %5, %cst {dimension_numbers = #tpu.dot_dimension_numbers<[1], [0], [0], [1], [0, 0, 1, 1], [], []>} : vector<8x32xf32>, vector<32x64xf32>, vector<8x64xf32> -> vector<8x64xf32>
    %c0_5 = arith.constant 0 : index
    %c0_6 = arith.constant 0 : index
    %7 = vector.load %arg14[%c0_5, %c0_6] : memref<8x64xf32, #tpu.memory_space<vmem>>, vector<8x64xf32>
    tpu.vector_store %arg14[%c0_5, %c0_6], %6 {strides = array<i32>} : memref<8x64xf32, #tpu.memory_space<vmem>>, vector<8x64xf32>,
    %c0_7 = arith.constant 0 : index
    %8 = memref.load %arg9[%c0_7] : memref<1xf32, #tpu.memory_space<smem>>
    %c0_8 = arith.constant 0 : index
    %c0_9 = arith.constant 0 : index
    %9 = vector.load %arg13[%c0_8, %c0_9] : memref<8x64xf32, #tpu.memory_space<vmem>>, vector<8x64xf32>
    %c0_10 = arith.constant 0 : index
    %c0_11 = arith.constant 0 : index
    %10 = vector.load %arg14[%c0_10, %c0_11] : memref<8x64xf32, #tpu.memory_space<vmem>>, vector<1x64xf32>
    %11 = vector.broadcast %10 : vector<1x64xf32> to vector<8x64xf32>
    %12 = arith.addf %9, %11 : vector<8x64xf32>
    %cst_12 = arith.constant 5.000000e-01 : f32
    %13 = vector.broadcast %cst_12 : f32 to vector<8x64xf32>
    %14 = arith.mulf %13, %12 : vector<8x64xf32>
    %cst_13 = arith.constant 0.707106769 : f32
    %15 = vector.broadcast %cst_13 : f32 to vector<8x64xf32>
    %16 = arith.mulf %12, %15 : vector<8x64xf32>
    %17 = math.erf %16 : vector<8x64xf32>
    %cst_14 = arith.constant 1.000000e+00 : f32
    %18 = vector.broadcast %cst_14 : f32 to vector<8x64xf32>
    %19 = arith.addf %18, %17 : vector<8x64xf32>
    %20 = arith.mulf %14, %19 : vector<8x64xf32>
    %c0_15 = arith.constant 0 : index
    %c0_16 = arith.constant 0 : index
    %21 = vector.load %arg8[%c0_15, %c0_16] : memref<64x1xf32, #tpu.memory_space<vmem>>, vector<64x1xf32>
    %cst_17 = arith.constant dense<0.000000e+00> : vector<8x1xf32>
    %22 = tpu.matmul %20, %21, %cst_17 {dimension_numbers = #tpu.dot_dimension_numbers<[1], [0], [0], [1], [0, 0, 1, 1], [], []>} : vector<8x64xf32>, vector<64x1xf32>, vector<8x1xf32> -> vector<8x1xf32>
    %c0_18 = arith.constant 0 : index
    %c0_19 = arith.constant 0 : index
    %23 = vector.load %arg13[%c0_18, %c0_19] : memref<8x64xf32, #tpu.memory_space<vmem>>, vector<8x64xf32>
    %c1 = arith.constant 1 : index
    %c0_20 = arith.constant 0 : index
    %24 = vector.load %arg14[%c1, %c0_20] : memref<8x64xf32, #tpu.memory_space<vmem>>, vector<1x64xf32>
    %25 = vector.broadcast %24 : vector<1x64xf32> to vector<8x64xf32>
    %26 = arith.addf %23, %25 : vector<8x64xf32>
    %cst_21 = arith.constant 5.000000e-01 : f32
    %27 = vector.broadcast %cst_21 : f32 to vector<8x64xf32>
    %28 = arith.mulf %27, %26 : vector<8x64xf32>
    %cst_22 = arith.constant 0.707106769 : f32
    %29 = vector.broadcast %cst_22 : f32 to vector<8x64xf32>
    %30 = arith.mulf %26, %29 : vector<8x64xf32>
    %31 = math.erf %30 : vector<8x64xf32>
    %cst_23 = arith.constant 1.000000e+00 : f32
    %32 = vector.broadcast %cst_23 : f32 to vector<8x64xf32>
    %33 = arith.addf %32, %31 : vector<8x64xf32>
    %34 = arith.mulf %28, %33 : vector<8x64xf32>
    %c0_24 = arith.constant 0 : index
    %c0_25 = arith.constant 0 : index
    %35 = vector.load %arg8[%c0_24, %c0_25] : memref<64x1xf32, #tpu.memory_space<vmem>>, vector<64x1xf32>
    %cst_26 = arith.constant dense<0.000000e+00> : vector<8x1xf32>
    %36 = tpu.matmul %34, %35, %cst_26 {dimension_numbers = #tpu.dot_dimension_numbers<[1], [0], [0], [1], [0, 0, 1, 1], [], []>} : vector<8x64xf32>, vector<64x1xf32>, vector<8x1xf32> -> vector<8x1xf32>
    %c0_27 = arith.constant 0 : index
    %c0_28 = arith.constant 0 : index
    %37 = vector.load %arg13[%c0_27, %c0_28] : memref<8x64xf32, #tpu.memory_space<vmem>>, vector<8x64xf32>
    %c2 = arith.constant 2 : index
    %c0_29 = arith.constant 0 : index
    %38 = vector.load %arg14[%c2, %c0_29] : memref<8x64xf32, #tpu.memory_space<vmem>>, vector<1x64xf32>
    %39 = vector.broadcast %38 : vector<1x64xf32> to vector<8x64xf32>
    %40 = arith.addf %37, %39 : vector<8x64xf32>
    %cst_30 = arith.constant 5.000000e-01 : f32
    %41 = vector.broadcast %cst_30 : f32 to vector<8x64xf32>
    %42 = arith.mulf %41, %40 : vector<8x64xf32>
    %cst_31 = arith.constant 0.707106769 : f32
    %43 = vector.broadcast %cst_31 : f32 to vector<8x64xf32>
    %44 = arith.mulf %40, %43 : vector<8x64xf32>
    %45 = math.erf %44 : vector<8x64xf32>
    %cst_32 = arith.constant 1.000000e+00 : f32
    %46 = vector.broadcast %cst_32 : f32 to vector<8x64xf32>
    %47 = arith.addf %46, %45 : vector<8x64xf32>
    %48 = arith.mulf %42, %47 : vector<8x64xf32>
    %c0_33 = arith.constant 0 : index
    %c0_34 = arith.constant 0 : index
    %49 = vector.load %arg8[%c0_33, %c0_34] : memref<64x1xf32, #tpu.memory_space<vmem>>, vector<64x1xf32>
    %cst_35 = arith.constant dense<0.000000e+00> : vector<8x1xf32>
    %50 = tpu.matmul %48, %49, %cst_35 {dimension_numbers = #tpu.dot_dimension_numbers<[1], [0], [0], [1], [0, 0, 1, 1], [], []>} : vector<8x64xf32>, vector<64x1xf32>, vector<8x1xf32> -> vector<8x1xf32>
    %c0_36 = arith.constant 0 : index
    %c0_37 = arith.constant 0 : index
    %51 = vector.load %arg13[%c0_36, %c0_37] : memref<8x64xf32, #tpu.memory_space<vmem>>, vector<8x64xf32>
    %c3 = arith.constant 3 : index
    %c0_38 = arith.constant 0 : index
    %52 = vector.load %arg14[%c3, %c0_38] : memref<8x64xf32, #tpu.memory_space<vmem>>, vector<1x64xf32>
    %53 = vector.broadcast %52 : vector<1x64xf32> to vector<8x64xf32>
    %54 = arith.addf %51, %53 : vector<8x64xf32>
    %cst_39 = arith.constant 5.000000e-01 : f32
    %55 = vector.broadcast %cst_39 : f32 to vector<8x64xf32>
    %56 = arith.mulf %55, %54 : vector<8x64xf32>
    %cst_40 = arith.constant 0.707106769 : f32
    %57 = vector.broadcast %cst_40 : f32 to vector<8x64xf32>
    %58 = arith.mulf %54, %57 : vector<8x64xf32>
    %59 = math.erf %58 : vector<8x64xf32>
    %cst_41 = arith.constant 1.000000e+00 : f32
    %60 = vector.broadcast %cst_41 : f32 to vector<8x64xf32>
    %61 = arith.addf %60, %59 : vector<8x64xf32>
    %62 = arith.mulf %56, %61 : vector<8x64xf32>
    %c0_42 = arith.constant 0 : index
    %c0_43 = arith.constant 0 : index
    %63 = vector.load %arg8[%c0_42, %c0_43] : memref<64x1xf32, #tpu.memory_space<vmem>>, vector<64x1xf32>
    %cst_44 = arith.constant dense<0.000000e+00> : vector<8x1xf32>
    %64 = tpu.matmul %62, %63, %cst_44 {dimension_numbers = #tpu.dot_dimension_numbers<[1], [0], [0], [1], [0, 0, 1, 1], [], []>} : vector<8x64xf32>, vector<64x1xf32>, vector<8x1xf32> -> vector<8x1xf32>
    %c0_45 = arith.constant 0 : index
    %c0_46 = arith.constant 0 : index
    %65 = vector.load %arg13[%c0_45, %c0_46] : memref<8x64xf32, #tpu.memory_space<vmem>>, vector<8x64xf32>
    %c4 = arith.constant 4 : index
    %c0_47 = arith.constant 0 : index
    %66 = vector.load %arg14[%c4, %c0_47] : memref<8x64xf32, #tpu.memory_space<vmem>>, vector<1x64xf32>
    %67 = vector.broadcast %66 : vector<1x64xf32> to vector<8x64xf32>
    %68 = arith.addf %65, %67 : vector<8x64xf32>
    %cst_48 = arith.constant 5.000000e-01 : f32
    %69 = vector.broadcast %cst_48 : f32 to vector<8x64xf32>
    %70 = arith.mulf %69, %68 : vector<8x64xf32>
    %cst_49 = arith.constant 0.707106769 : f32
    %71 = vector.broadcast %cst_49 : f32 to vector<8x64xf32>
    %72 = arith.mulf %68, %71 : vector<8x64xf32>
    %73 = math.erf %72 : vector<8x64xf32>
    %cst_50 = arith.constant 1.000000e+00 : f32
    %74 = vector.broadcast %cst_50 : f32 to vector<8x64xf32>
    %75 = arith.addf %74, %73 : vector<8x64xf32>
    %76 = arith.mulf %70, %75 : vector<8x64xf32>
    %c0_51 = arith.constant 0 : index
    %c0_52 = arith.constant 0 : index
    %77 = vector.load %arg8[%c0_51, %c0_52] : memref<64x1xf32, #tpu.memory_space<vmem>>, vector<64x1xf32>
    %cst_53 = arith.constant dense<0.000000e+00> : vector<8x1xf32>
    %78 = tpu.matmul %76, %77, %cst_53 {dimension_numbers = #tpu.dot_dimension_numbers<[1], [0], [0], [1], [0, 0, 1, 1], [], []>} : vector<8x64xf32>, vector<64x1xf32>, vector<8x1xf32> -> vector<8x1xf32>
    %c0_54 = arith.constant 0 : index
    %c0_55 = arith.constant 0 : index
    %79 = vector.load %arg13[%c0_54, %c0_55] : memref<8x64xf32, #tpu.memory_space<vmem>>, vector<8x64xf32>
    %c5 = arith.constant 5 : index
    %c0_56 = arith.constant 0 : index
    %80 = vector.load %arg14[%c5, %c0_56] : memref<8x64xf32, #tpu.memory_space<vmem>>, vector<1x64xf32>
    %81 = vector.broadcast %80 : vector<1x64xf32> to vector<8x64xf32>
    %82 = arith.addf %79, %81 : vector<8x64xf32>
    %cst_57 = arith.constant 5.000000e-01 : f32
    %83 = vector.broadcast %cst_57 : f32 to vector<8x64xf32>
    %84 = arith.mulf %83, %82 : vector<8x64xf32>
    %cst_58 = arith.constant 0.707106769 : f32
    %85 = vector.broadcast %cst_58 : f32 to vector<8x64xf32>
    %86 = arith.mulf %82, %85 : vector<8x64xf32>
    %87 = math.erf %86 : vector<8x64xf32>
    %cst_59 = arith.constant 1.000000e+00 : f32
    %88 = vector.broadcast %cst_59 : f32 to vector<8x64xf32>
    %89 = arith.addf %88, %87 : vector<8x64xf32>
    %90 = arith.mulf %84, %89 : vector<8x64xf32>
    %c0_60 = arith.constant 0 : index
    %c0_61 = arith.constant 0 : index
    %91 = vector.load %arg8[%c0_60, %c0_61] : memref<64x1xf32, #tpu.memory_space<vmem>>, vector<64x1xf32>
    %cst_62 = arith.constant dense<0.000000e+00> : vector<8x1xf32>
    %92 = tpu.matmul %90, %91, %cst_62 {dimension_numbers = #tpu.dot_dimension_numbers<[1], [0], [0], [1], [0, 0, 1, 1], [], []>} : vector<8x64xf32>, vector<64x1xf32>, vector<8x1xf32> -> vector<8x1xf32>
    %c0_63 = arith.constant 0 : index
    %c0_64 = arith.constant 0 : index
    %93 = vector.load %arg13[%c0_63, %c0_64] : memref<8x64xf32, #tpu.memory_space<vmem>>, vector<8x64xf32>
    %c6 = arith.constant 6 : index
    %c0_65 = arith.constant 0 : index
    %94 = vector.load %arg14[%c6, %c0_65] : memref<8x64xf32, #tpu.memory_space<vmem>>, vector<1x64xf32>
    %95 = vector.broadcast %94 : vector<1x64xf32> to vector<8x64xf32>
    %96 = arith.addf %93, %95 : vector<8x64xf32>
    %cst_66 = arith.constant 5.000000e-01 : f32
    %97 = vector.broadcast %cst_66 : f32 to vector<8x64xf32>
    %98 = arith.mulf %97, %96 : vector<8x64xf32>
    %cst_67 = arith.constant 0.707106769 : f32
    %99 = vector.broadcast %cst_67 : f32 to vector<8x64xf32>
    %100 = arith.mulf %96, %99 : vector<8x64xf32>
    %101 = math.erf %100 : vector<8x64xf32>
    %cst_68 = arith.constant 1.000000e+00 : f32
    %102 = vector.broadcast %cst_68 : f32 to vector<8x64xf32>
    %103 = arith.addf %102, %101 : vector<8x64xf32>
    %104 = arith.mulf %98, %103 : vector<8x64xf32>
    %c0_69 = arith.constant 0 : index
    %c0_70 = arith.constant 0 : index
    %105 = vector.load %arg8[%c0_69, %c0_70] : memref<64x1xf32, #tpu.memory_space<vmem>>, vector<64x1xf32>
    %cst_71 = arith.constant dense<0.000000e+00> : vector<8x1xf32>
    %106 = tpu.matmul %104, %105, %cst_71 {dimension_numbers = #tpu.dot_dimension_numbers<[1], [0], [0], [1], [0, 0, 1, 1], [], []>} : vector<8x64xf32>, vector<64x1xf32>, vector<8x1xf32> -> vector<8x1xf32>
    %c0_72 = arith.constant 0 : index
    %c0_73 = arith.constant 0 : index
    %107 = vector.load %arg13[%c0_72, %c0_73] : memref<8x64xf32, #tpu.memory_space<vmem>>, vector<8x64xf32>
    %c7 = arith.constant 7 : index
    %c0_74 = arith.constant 0 : index
    %108 = vector.load %arg14[%c7, %c0_74] : memref<8x64xf32, #tpu.memory_space<vmem>>, vector<1x64xf32>
    %109 = vector.broadcast %108 : vector<1x64xf32> to vector<8x64xf32>
    %110 = arith.addf %107, %109 : vector<8x64xf32>
    %cst_75 = arith.constant 5.000000e-01 : f32
    %111 = vector.broadcast %cst_75 : f32 to vector<8x64xf32>
    %112 = arith.mulf %111, %110 : vector<8x64xf32>
    %cst_76 = arith.constant 0.707106769 : f32
    %113 = vector.broadcast %cst_76 : f32 to vector<8x64xf32>
    %114 = arith.mulf %110, %113 : vector<8x64xf32>
    %115 = math.erf %114 : vector<8x64xf32>
    %cst_77 = arith.constant 1.000000e+00 : f32
    %116 = vector.broadcast %cst_77 : f32 to vector<8x64xf32>
    %117 = arith.addf %116, %115 : vector<8x64xf32>
    %118 = arith.mulf %112, %117 : vector<8x64xf32>
    %c0_78 = arith.constant 0 : index
    %c0_79 = arith.constant 0 : index
    %119 = vector.load %arg8[%c0_78, %c0_79] : memref<64x1xf32, #tpu.memory_space<vmem>>, vector<64x1xf32>
    %cst_80 = arith.constant dense<0.000000e+00> : vector<8x1xf32>
    %120 = tpu.matmul %118, %119, %cst_80 {dimension_numbers = #tpu.dot_dimension_numbers<[1], [0], [0], [1], [0, 0, 1, 1], [], []>} : vector<8x64xf32>, vector<64x1xf32>, vector<8x1xf32> -> vector<8x1xf32>
    %121 = tpu.concatenate %22, %36, %50, %64, %78, %92, %106, %120 in 1 : vector<8x1xf32>, vector<8x1xf32>, vector<8x1xf32>, vector<8x1xf32>, vector<8x1xf32>, vector<8x1xf32>, vector<8x1xf32>, vector<8x1xf32> -> vector<8x8xf32>
    %122 = vector.broadcast %8 : f32 to vector<8x8xf32>
    %123 = arith.addf %121, %122 : vector<8x8xf32>
    %c0_81 = arith.constant 0 : index
    %c0_82 = arith.constant 0 : index
    %c0_83 = arith.constant 0 : index
    %124 = vector.load %arg12[%c0_81, %c0_82, %c0_83] : memref<1x8x8xf32, #tpu.memory_space<vmem>>, vector<1x8x8xf32>
    %125 = vector.shape_cast %124 : vector<1x8x8xf32> to vector<8x8xf32>
    %126 = vector.shape_cast %123 : vector<8x8xf32> to vector<1x8x8xf32>
    tpu.vector_store %arg12[%c0_81, %c0_82, %c0_83], %126 {strides = array<i32>} : memref<1x8x8xf32, #tpu.memory_space<vmem>>, vector<1x8x8xf32>,
    return
  }
  func.func @transform_0(%arg0: i32, %arg1: i32, %arg2: i32) -> (i32, i32, i32) {
    %c0_i32 = arith.constant 0 : i32
    %c0_i32_0 = arith.constant 0 : i32
    return %arg0, %arg1, %c0_i32 : i32, i32, i32
  }
  func.func @transform_1(%arg0: i32, %arg1: i32, %arg2: i32) -> (i32, i32, i32) {
    %c0_i32 = arith.constant 0 : i32
    %c0_i32_0 = arith.constant 0 : i32
    return %arg0, %arg2, %c0_i32 : i32, i32, i32
  }
  func.func @transform_2(%arg0: i32, %arg1: i32, %arg2: i32) -> (i32, i32) {
    %c0_i32 = arith.constant 0 : i32
    %c0_i32_0 = arith.constant 0 : i32
    %c0_i32_1 = arith.constant 0 : i32
    return %c0_i32, %c0_i32_0 : i32, i32
  }
  func.func @transform_3(%arg0: i32, %arg1: i32, %arg2: i32) -> (i32, i32) {
    %c0_i32 = arith.constant 0 : i32
    %c0_i32_0 = arith.constant 0 : i32
    %c0_i32_1 = arith.constant 0 : i32
    return %c0_i32, %c0_i32_0 : i32, i32
  }
  func.func @transform_4(%arg0: i32, %arg1: i32, %arg2: i32) -> (i32, i32) {
    %c0_i32 = arith.constant 0 : i32
    %c0_i32_0 = arith.constant 0 : i32
    %c0_i32_1 = arith.constant 0 : i32
    return %c0_i32, %c0_i32_0 : i32, i32
  }
  func.func @transform_5(%arg0: i32, %arg1: i32, %arg2: i32) -> (i32, i32) {
    %c0_i32 = arith.constant 0 : i32
    %c0_i32_0 = arith.constant 0 : i32
    %c0_i32_1 = arith.constant 0 : i32
    return %c0_i32, %c0_i32_0 : i32, i32
  }
  func.func @transform_6(%arg0: i32, %arg1: i32, %arg2: i32) -> i32 {
    %c0_i32 = arith.constant 0 : i32
    %c0_i32_0 = arith.constant 0 : i32
    return %c0_i32 : i32
  }
  func.func @transform_7(%arg0: i32, %arg1: i32, %arg2: i32) -> (i32, i32, i32) {
    %c0_i32 = arith.constant 0 : i32
    %c0_i32_0 = arith.constant 0 : i32
    return %arg0, %arg1, %c0_i32 : i32, i32, i32
  }
  func.func @transform_8(%arg0: i32, %arg1: i32, %arg2: i32) -> (i32, i32, i32) {
    %c0_i32 = arith.constant 0 : i32
    %c0_i32_0 = arith.constant 0 : i32
    return %arg0, %arg1, %c0_i32 : i32, i32, i32
  }
  func.func @transform_9(%arg0: i32, %arg1: i32, %arg2: i32) -> (i32, i32, i32) {
    %c0_i32 = arith.constant 0 : i32
    return %arg0, %arg1, %arg2 : i32, i32, i32
  }
}

</mosaic_0001>

<bundles_post_ra>
// kernel: tpu_custom_call.1
= control target key start
LH: loop header
LB: loop body
LE: loop exit
PB: predicated region body
PF: predicated region fallthrough
CT: control target
= control target key end

     0   :  { %s2691_s0 = inlined_call_operand.hbm [shape: f32[2,8,32], index: 0, kind: input, shape index: {}]   ;;  %s2692_s1 = inlined_call_operand.hbm [shape: f32[2,8,32], index: 1, kind: input, shape index: {}]   ;;  %s2693_s2 = inlined_call_operand.vmem [shape: f32[32,66], index: 2, kind: input, shape index: {}]   ;;  %s2694_s3 = inlined_call_operand.vmem [shape: f32[1,66], index: 3, kind: input, shape index: {}]   ;;  %s2695_s4 = inlined_call_operand.vmem [shape: f32[32,64], index: 4, kind: input, shape index: {}]   ;;  %s2696_s5 = inlined_call_operand.vmem [shape: f32[64,1], index: 5, kind: input, shape index: {}]   ;;  %s2697_s6 = inlined_call_operand.<no memory space> [shape: f32[1], index: 6, kind: input, shape index: {}]   ;;  %s2698_s7 = inlined_call_operand.vmem [shape: f32[2,8,1], index: 7, kind: output, shape index: {0}]   ;;  %s2699_s8 = inlined_call_operand.vmem [shape: f32[2,8,1], index: 8, kind: output, shape index: {1}]   ;;  %s2700_s9 = inlined_call_operand.hbm [shape: f32[2,8,8], index: 9, kind: output, shape index: {2}]  }
   0x1   :  { %2707 = sst [smem:[#allocation16_spill]] %s2691_s0 }
   0x2   :  { %15 = sst [smem:[#allocation4]] %s2697_s6 }
   0x3   :  { %16 = vsyncpa [#allocation6], 0 }
   0x4   :  { %18 = vsyncpa [#allocation6 + $0x1], 0 }
   0x5   :  { %19 = vsyncpa [#allocation9], 0 }
   0x6   :  { %21 = vsyncpa [#allocation9 + $0x1], 0 }
   0x7   :  { %22 = vsyncpa [#allocation7], 0 }
   0x8   :  { %24 = vsyncpa [#allocation7 + $0x1], 0  ;;  %s2281_s11 = smov 0   ;;  %s2283_s12 = smov 0  }
   0x9   :  { %s2285_s13 = smov 0   ;;  %s2287_s14 = smov 0  }
   0xa   :  { %s2289_s15 = smov 0   ;;  %s2291_s16 = smov 0  }
   0xb LB: > { %2708 = sst [smem:[#allocation14_spill]] %s2207_s15  ;;  %s1569_s6 = sadd.s32 4294967295, %s2211_s16   ;;  %s2211_s16 = sphi %s2291_s16, %s30_s16   ;;  %s2207_s15 = sphi %s2289_s15, %s2727_s15   ;;  %s2203_s14 = sphi %s2287_s14, %s2726_s14   ;;  %s2199_s13 = sphi %s2285_s13, %s2730_s13   ;;  %s2195_s12 = sphi %s2283_s12, %s2729_s12   ;;  %s2191_s11 = sphi %s2281_s11, %s2728_s11  }
   0xc   : > { %s1570_s17 = sadd.s32 4294967294, %s2211_s16   ;;  %s49_s18 = sadd.s32 1, %s2207_s15 }
   0xd   : > { %s58_s19 = sadd.s32 1, %s2199_s13  ;;  %p51_p0 = scmp.ge.s32.totalorder %s49_s18, 2 }
   0xe   : > { %p65_p1 = scmp.ne.s32.totalorder %s2199_s13, %s2195_s12  ;;  %p66_p2 = scmp.eq.s32.totalorder %s2211_s16, 0 }
   0xf   : > { %p71_p3 = scmp.ne.s32.totalorder %s2195_s12, %s2191_s11  ;;  %s2732_s18 = smov (%p51_p0, %s49_s18), 0 }
  0x10   : > { %2709 = sst [smem:[#allocation15_spill]] %s2732_s18  ;;  %p2322_p4 = por %p66_p2, %p65_p1 }
  0x11   : > { %p72_p5 = scmp.eq.s32.totalorder %s1569_s6, 0  ;;  %s53_s21 = ssub.s32 %s2207_s15, %s2732_s18 }
  0x12   : > { %p288_p6 = scmp.eq.s32.totalorder %s1569_s6, 1  ;;  %p56_p7 = scmp.eq.s32.totalorder %s53_s21, 0 }
  0x13   : > { %p2328_p8 = por %p72_p5, %p71_p3  ;;  %p294_p10 = scmp.eq.s32.totalorder %s1570_s17, 1 }
  0x14   : > { %p2332_p9 = por %p288_p6, %p65_p1  ;;  %p1987_p13 = scmp.lt.s32.totalorder %s2211_s16, 2 }
  0x15   : > { %s2711_s22 = scalar_select %p2328_p8, 1, 0 }
  0x16   : > { %s2712_s23 = scalar_select %p2332_p9, 1, 0 }
  0x17   : > { %s2337_s24 = scalar_select %p56_p7, %s2199_s13, %s58_s19  }
  0x18   : > { %p2339_p11 = por %p294_p10, %p71_p3  ;;  %s2346_s26 = sand.u32 1, %s2199_s13  }
  0x19   : > { %s2701_s27 = sshll.u32 %s2346_s26, 3  ;;  %s2702_s28 = sshll.u32 %s2207_s15, 7 }
  0x1a   : > { %s2713_s25 = scalar_select %p2339_p11, 1, 0 }
  0x1b   : > { %s2714_s0 = sld [smem:[#allocation16_spill]]  ;;  %s333_s6 = scalar_lea.vmem [#allocation5], %s2701_s27 }
  0x1c   : > { %s341_s17 = sshll.u32 %s333_s6, 4  ;;  %p2363_p0 = pnand %p1987_p13, %p2322_p4  ;;  %s2359_s17 = int_to_ptr.vmem [resolvable:$true] %s341_s17 }
  0x1d   : > { %s330_s21 = scalar_lea.sflag [#allocation6], %s2346_s26 }
  0x1e   : > { %p2067_p5 = pneg %p2363_p0 }
  0x21   : > { %s2355_s10 = scalar_lea.hbm %s2714_s0, %s2702_s28  ;;  %s2070_s20 = scalar_lea.hbm %s2714_s0, 256 }
  0x22   : > { %s2065_s29 = scalar_lea.hbm %s2355_s10, 128  ;;  %p2071_p4 = scmp.lt.u32.totalorder %s2355_s10, %s2714_s0 }
  0x23   : > { %p2066_p3 = scmp.ne.s32.totalorder %s2355_s10, %s2065_s29  ;;  %p2072_p10 = scmp.lt.u32.totalorder %s2070_s20, %s2065_s29 }
  0x24   : > { %p2074_p12 = scmp.lt.u32.totalorder %s2065_s29, %s2355_s10 }
  0x25   : > { %p2068_p6 = pnand %p2067_p5, %p2066_p3  ;;  %p2073_p13 = por %p2072_p10, %p2071_p4 }
  0x27   : > { %p2069_p7 = pneg %p2068_p6  ;;  %p2075_p1 = por %p2074_p12, %p2073_p13 }
  0x29   : > { %p2076_p2 = pnand %p2075_p1, %p2069_p7 }
  0x2b   : > { %2079 = shalt.err (!%p2076_p2)
}
  0x2c   : > { %s2080_s18 = scalar_lea.vmem %s2359_s17, 128  ;;  %s2213_s30 = smov [#allocation5]  }
  0x2d   : > { %p2081_p3 = scmp.ne.s32.totalorder %s2359_s17, %s2080_s18  ;;  %s2085_s6 = sshll.u32 %s2213_s30, 4  ;;  %s2086_s6 = int_to_ptr.vmem [resolvable:$false] %s2085_s6 }
  0x2e   : > { %s2087_s27 = scalar_lea.vmem %s2086_s6, 256  ;;  %p2088_p9 = scmp.lt.s32.totalorder %s2359_s17, %s2086_s6 }
  0x2f   : > { %p2083_p6 = pnand %p2081_p3, %p2067_p5  ;;  %p2089_p4 = scmp.lt.s32.totalorder %s2087_s27, %s2080_s18 }
  0x31   : > { %p2084_p11 = pneg %p2083_p6  ;;  %p2090_p10 = por %p2089_p4, %p2088_p9 }
  0x33   : > { %p2091_p12 = pnand %p2090_p10, %p2084_p11 }
  0x35   : > { %2094 = shalt.err (!%p2091_p12)
}
  0x36   : > { %1979 = dma.hbm_to_vmem [thread:$0]  (!%p2363_p0), %s2355_s10, 128, %s2359_s17, %s330_s21  }
  0x37   : > { %p2716_p1 = scmp.lt.s32.totalorder %s2211_s16, 3  ;;  %p2717_p2 = scmp.ge.s32.totalorder %s2211_s16, 1 }
  0x38   : > { %s2719_s18 = sshll.u32 %s2207_s15, 7  ;;  %s2720_s6 = sshll.u32 %s2346_s26, 3 }
  0x39   : > { %p2399_p7 = pnand %p2717_p2, %p2716_p1  ;;  %s2408_s30 = scalar_lea.hbm %s2692_s1, %s2719_s18 }
  0x3a   : > { %s352_s27 = scalar_lea.vmem [#allocation8], %s2720_s6  ;;  %s349_s10 = scalar_lea.sflag [#allocation9], %s2346_s26 }
  0x3b   : > { %s2718_s28 = scalar_select %p2399_p7, 1, 0 }
  0x3c   : > { %s360_s0 = sshll.u32 %s352_s27, 4  ;;  %s2095_s17 = scalar_lea.hbm %s2408_s30, 128  ;;  %s361_s0 = int_to_ptr.vmem [resolvable:$true] %s360_s0 }
  0x3d   : > { %p2096_p9 = scmp.ne.s32.totalorder %s2408_s30, %s2095_s17  ;;  %s2100_s18 = scalar_lea.hbm %s2692_s1, 256 }
  0x3e   : > { %p2101_p3 = scmp.lt.u32.totalorder %s2408_s30, %s2692_s1  ;;  %p2102_p6 = scmp.lt.u32.totalorder %s2100_s18, %s2095_s17 }
  0x3f   : > { %p2098_p11 = pnand %p2096_p9, %p2067_p5  ;;  %p2104_p10 = scmp.lt.u32.totalorder %s2095_s17, %s2408_s30 }
  0x40   : > { %p2103_p4 = por %p2102_p6, %p2101_p3 }
  0x41   : > { %p2099_p13 = pneg %p2098_p11 }
  0x42   : > { %p2105_p12 = por %p2104_p10, %p2103_p4 }
  0x44   : > { %p2106_p1 = pnand %p2105_p12, %p2099_p13 }
  0x46   : > { %2109 = shalt.err (!%p2106_p1)
}
  0x47   : > { %s2110_s26 = scalar_lea.vmem %s361_s0, 128  ;;  %s2214_s6 = smov [#allocation8]  }
  0x48   : > { %p2111_p2 = scmp.ne.s32.totalorder %s361_s0, %s2110_s26  ;;  %s2115_s15 = sshll.u32 %s2214_s6, 4  ;;  %s2116_s15 = int_to_ptr.vmem [resolvable:$false] %s2115_s15 }
  0x49   : > { %s2117_s27 = scalar_lea.vmem %s2116_s15, 256  ;;  %p2118_p8 = scmp.lt.s32.totalorder %s361_s0, %s2116_s15 }
  0x4a   : > { %p2113_p9 = pnand %p2111_p2, %p2067_p5  ;;  %p2119_p7 = scmp.lt.s32.totalorder %s2117_s27, %s2110_s26 }
  0x4c   : > { %p2114_p11 = pneg %p2113_p9  ;;  %p2120_p3 = por %p2119_p7, %p2118_p8 }
  0x4e   : > { %p2121_p6 = pnand %p2120_p3, %p2114_p11 }
  0x50   : > { %2124 = shalt.err (!%p2121_p6)
}
  0x51   : > { %1982 = dma.hbm_to_vmem [thread:$0]  (!%p2363_p0), %s2408_s30, 128, %s361_s0, %s349_s10  }
  0x52   : > { %p2721_p13 = scmp.ne.s32.totalorder %s2718_s28, 0 }
  0x53   : > { %s2435_s17 = sand.u32 (!%p2721_p13), 1, %s2195_s12   ;;  %p2722_p8 = scmp.ne.s32.totalorder (!%p2721_p13), %s2711_s22, 0 }
  0x54   : > { %369 = sbr.rel (%p2721_p13) target bundleno = 740 (0x2e4), region = 48  ;;  %s2438_s21 = sshll.u32 (!%p2721_p13), %s2435_s17, 3 }
  0x55   : > { %s372_s18 = scalar_lea.sflag (!%p2721_p13), [#allocation6], %s2435_s17  ;;  %s375_s29 = scalar_lea.vmem (!%p2721_p13), [#allocation5], %s2438_s21 }
  0x5b   : > { %2178 = dma.done.wait (%p2722_p8), %s372_s18, 128  }
  0x5c   : > { %2180 = vsyncadd (%p2722_p8), %s372_s18, 4294967168  ;;  %s381_s0 = scalar_lea.sflag [#allocation9], %s2435_s17  ;;  %s384_s19 = scalar_lea.vmem [#allocation8], %s2438_s21 }
  0x5d   : > { %2182 = dma.done.wait (%p2722_p8), %s381_s0, 128  }
  0x5e   : > { %2184 = vsyncadd (%p2722_p8), %s381_s0, 4294967168  ;;  %v2215_v0 = vmov 0.0|0.0   ;;  %vm2216_vm0 = vmmov 0   ;;  %v2217_v1 = vmov 0.0   ;;  %v457_v2 = vld [vmem:[%s2693_s2] sm:$0xff]  ;;  %v458_v3 = vld [vmem:[%s2693_s2 + $0x8] sm:$0xff] }
  0x5f   : > { %1862 = vmatprep.subr.bf16.mxu0 %v2215_v0  ;;  %1868 = vmatprep.subr.bf16.mxu1 %v2215_v0  ;;  %v555_v4 = vld [vmem:[%s2695_s4] sm:$0xff]  ;;  %v1863_v5 = vpack.c.bf16 %v458_v3, %v457_v2  ;;  %v556_v6 = vld [vmem:[%s2695_s4 + $0x8] sm:$0xff]  ;;  %v459_v7 = vld [vmem:[%s2693_s2 + $0x10] sm:$0xff]  ;;  %vm468_vm1 = vcmask 261120   ;;  %vm542_vm2 = vcmask 523264   ;;  %s2218_s27 = smov 1  }
  0x60   : > { %1696 = vmatprep.mubr.msk.f32.mxu0 %vm2216_vm0, %v2217_v1  ;;  %1707 = vmatprep.mubr.msk.f32.mxu1 %vm2216_vm0, %v2217_v1  ;;  %v460_v8 = vld [vmem:[%s2693_s2 + $0x18] sm:$0xff]  ;;  %v1869_v9 = vpack.c.bf16 %v556_v6, %v555_v4  ;;  %v557_v10 = vld [vmem:[%s2695_s4 + $0x10] sm:$0xff]  ;;  %v554_v15 = vld [vmem:[%s384_s19] sm:$0xff]  ;;  %s2219_s18 = smov 2   ;;  %s2220_s0 = smov 3   ;;  %vm548_vm3 = vcmask 7168  }
  0x61   : > { %v558_v11 = vld [vmem:[%s2695_s4 + $0x18] sm:$0xff]  ;;  %1864 = vmatpush3.bf16.msra.mxu0 %v1863_v5  ;;  %v1866_v12 = vpack.c.bf16 %v460_v8, %v459_v7  ;;  %v648_v16 = vld [vmem:[%s2696_s5] sm:$0xff]  ;;  %v649_v17 = vld [vmem:[%s2696_s5 + $0x8] sm:$0xff]  ;;  %s2221_s28 = smov 4   ;;  %s2222_s30 = smov 5   ;;  %vm1347_vm4 = vcmask 15360  }
  0x62   : > { %1870 = vmatpush3.bf16.msra.mxu1 %v1869_v9  ;;  %1865 = vmatprep.subr.bf16.mxu0 %v2215_v0  ;;  %v1872_v13 = vpack.c.bf16 %v558_v11, %v557_v10  ;;  %v456_v14 = vld [vmem:[%s375_s29] sm:$0xff]  ;;  %v2501_v19 = vpack.c.bf16 %v649_v17, %v648_v16  ;;  %v652_v22 = vld [vmem:[%s2696_s5 + $0x20] sm:$0xff]  ;;  %v653_v23 = vld [vmem:[%s2696_s5 + $0x28] sm:$0xff]  ;;  %s2223_s10 = smov 6   ;;  %s2224_s22 = smov 7   ;;  %vm1349_vm5 = vcmask 23552  }
  0x63   : > { %1871 = vmatprep.subr.bf16.mxu1 %v2215_v0  ;;  %v650_v18 = vld [vmem:[%s2696_s5 + $0x10] sm:$0xff]  ;;  %v651_v20 = vld [vmem:[%s2696_s5 + $0x18] sm:$0xff]  ;;  %v2520_v24 = vpack.c.bf16 %v653_v23, %v652_v22  ;;  %v1583_v28 = vld [vmem:[%s2694_s3] ss:$0 sm:$0xff]  ;;  %s2225_s20 = smov 64   ;;  %s2226_s26 = smov 63  }
  0x64   : > { %v2508_v21 = vpack.c.bf16 %v651_v20, %v650_v18  ;;  %v654_v25 = vld [vmem:[%s2696_s5 + $0x30] sm:$0xff]  ;;  %v655_v26 = vld [vmem:[%s2696_s5 + $0x38] sm:$0xff]  ;;  %p438_p0 = scmp.lt.s32.totalorder %s2203_s14, 1  ;;  %s635_s6 = sld [smem:[#allocation4]]  ;;  %vm1351_vm6 = vcmask 31744   ;;  %vm1353_vm7 = vcmask 39936  }
  0x65   : > { %1867 = vmatpush3.bf16.msra.mxu0 %v1866_v12  ;;  %v2532_v27 = vpack.c.bf16 %v655_v26, %v654_v25  ;;  %vm1355_vm8 = vcmask 48128   ;;  %vm1357_vm9 = vcmask 56320   ;;  %s1603_s19 = sshll.u32 %s2203_s14, 7  ;;  %vm1361_vm10 = vcmask 64512   ;;  %p2723_p7 = scmp.ne.s32.totalorder %s2712_s23, 0 }
  0x66   : > { %1873 = vmatpush3.bf16.msra.mxu1 %v1872_v13  ;;  %1874 = vmatprep.subr.bf16.mxu0 %v2215_v0  ;;  %s439_s29 = scalar_select %p438_p0, %s2203_s14, 1 }
  0x67   : > { %1886 = vmatprep.subr.bf16.mxu1 %v2215_v0  ;;  %s2640_s14 = scalar_lea.hbm %s2700_s9, %s1603_s19 }
  0x68   : > { %1697 = vmatmul.mubr.msk.f32.vlgmr.msra.gmra.mrb[0].mxu0 %vm468_vm1, %v456_v14  ;;  %s1581_s15 = sshll.u32 %s439_s29, 3 }
  0x69   : > { %1708 = vmatmul.mubr.msk.f32.vlgmr.msra.gmra.mrb[0].mxu1 %vm468_vm1, %v554_v15  ;;  %1726 = vmatprep.mubr.msk.f32.mxu0 %vm2216_vm0, %v2217_v1 }
  0x6a   : > { %1745 = vmatprep.mubr.msk.f32.mxu1 %vm2216_vm0, %v2217_v1  ;;  %1876 = vmatpush3.bf16.msra.mxu0 %v2501_v19 }
  0x6b   : > { %1888 = vmatpush3.bf16.msra.mxu1 %v2501_v19  ;;  %1877 = vmatprep.subr.bf16.mxu0 %v2215_v0 }
  0x6c   : > { %1889 = vmatprep.subr.bf16.mxu1 %v2215_v0 }
  0x6e   : > { %1879 = vmatpush3.bf16.msra.mxu0 %v2508_v21 }
  0x6f   : > { %1891 = vmatpush3.bf16.msra.mxu1 %v2508_v21  ;;  %1880 = vmatprep.subr.bf16.mxu0 %v2215_v0 }
  0x70   : > { %1892 = vmatprep.subr.bf16.mxu1 %v2215_v0 }
  0x72   : > { %1882 = vmatpush3.bf16.msra.mxu0 %v2520_v24 }
  0x73   : > { %1894 = vmatpush3.bf16.msra.mxu1 %v2520_v24  ;;  %1883 = vmatprep.subr.bf16.mxu0 %v2215_v0 }
  0x74   : > { %1895 = vmatprep.subr.bf16.mxu1 %v2215_v0 }
  0x76   : > { %1885 = vmatpush3.bf16.msra.mxu0 %v2532_v27 }
  0x77   : > { %1897 = vmatpush3.bf16.msra.mxu1 %v2532_v27  ;;  %1898 = vmatprep.subr.bf16.mxu0 %v2215_v0 }
  0x78   : > { %1910 = vmatprep.subr.bf16.mxu1 %v2215_v0 }
 0x13b   : > { %v538_v29 = vpop.f32.mrb[0].mxu0 }
 0x13c   : > { %v2543_v30 = vadd.f32 %v1583_v28, %v538_v29  ;;  %v1698_v31 = vpop.f32.mrb[1].mxu0  ;;  %v629_v32 = vpop.f32.mrb[0].mxu1 }
 0x13d   : > { %634 = vst.msk [vmem:[#allocation3] sm:$0xff] %vm542_vm2, %v629_v32  ;;  %v1709_v33 = vpop.f32.mrb[1].mxu1 }
 0x13e   : > { %543 = vst.msk [vmem:[#allocation2] sm:$0xff] %vm542_vm2, %v2543_v30 }
 0x144   : > { %v1586_v34 = vld [vmem:[#allocation3] ss:$0 sm:$0xff]  ;;  %v1588_v35 = vld [vmem:[#allocation3 + $0x1] ss:$0 sm:$0xff]  ;;  %v1590_v41 = vld [vmem:[#allocation3 + $0x2] ss:$0 sm:$0xff] }
 0x145   : > { %v2548_v36 = vld [vmem:[#allocation2] sm:$0xff]  ;;  %v1592_v42 = vld [vmem:[#allocation3 + $0x3] ss:$0 sm:$0xff]  ;;  %v1594_v55 = vld [vmem:[#allocation3 + $0x4] ss:$0 sm:$0xff] }
 0x146   : > { %v642_v37 = vadd.f32 %v1586_v34, %v2548_v36  ;;  %v734_v38 = vadd.f32 %v1588_v35, %v2548_v36  ;;  %v818_v43 = vadd.f32 %v1590_v41, %v2548_v36  ;;  %v902_v44 = vadd.f32 %v1592_v42, %v2548_v36  ;;  %v1596_v56 = vld [vmem:[#allocation3 + $0x5] ss:$0 sm:$0xff]  ;;  %v1598_v7 = vld [vmem:[#allocation3 + $0x6] ss:$0 sm:$0xff]  ;;  %v1600_v8 = vld [vmem:[#allocation3 + $0x7] ss:$0 sm:$0xff] }
 0x147   : > { %v986_v57 = vadd.f32 %v1594_v55, %v2548_v36  ;;  %v1070_v58 = vadd.f32 %v1596_v56, %v2548_v36  ;;  %v1154_v9 = vadd.f32 %v1598_v7, %v2548_v36  ;;  %v1238_v10 = vadd.f32 %v1600_v8, %v2548_v36 }
 0x148   : > { %v644_v39 = vmul.f32 0.70710677, %v642_v37  ;;  %v736_v40 = vmul.f32 0.70710677, %v734_v38  ;;  %v820_v45 = vmul.f32 0.70710677, %v818_v43 }
 0x149   : > { %v904_v46 = vmul.f32 0.70710677, %v902_v44  ;;  %v643_v49 = vmul.f32 0.5, %v642_v37  ;;  %v735_v51 = vmul.f32 0.5, %v734_v38  ;;  %v988_v61 = vmul.f32 0.70710677, %v986_v57 }
 0x14a   : > { %2049 = verf.f32 %v644_v39  ;;  %v1072_v63 = vmul.f32 0.70710677, %v1070_v58  ;;  %v819_v3 = vmul.f32 0.5, %v818_v43  ;;  %v903_v4 = vmul.f32 0.5, %v902_v44 }
 0x14b   : > { %2051 = verf.f32 %v736_v40  ;;  %v1156_v13 = vmul.f32 0.70710677, %v1154_v9  ;;  %v1240_v15 = vmul.f32 0.70710677, %v1238_v10  ;;  %v987_v17 = vmul.f32 0.5, %v986_v57 }
 0x14c   : > { %2053 = verf.f32 %v820_v45  ;;  %v1071_v18 = vmul.f32 0.5, %v1070_v58  ;;  %v1155_v26 = vmul.f32 0.5, %v1154_v9 }
 0x14d   : > { %2055 = verf.f32 %v904_v46 }
 0x14e   : > { %2057 = verf.f32 %v988_v61 }
 0x14f   : > { %2059 = verf.f32 %v1072_v63 }
 0x150   : > { %2061 = verf.f32 %v1156_v13 }
 0x151   : > { %2063 = verf.f32 %v1240_v15 }
 0x154   : > { %v2050_v47 = vpop.eup %2049 }
 0x155   : > { %v2052_v48 = vpop.eup %2051  ;;  %v646_v50 = vadd.f32 1.0, %v2050_v47 }
 0x156   : > { %v738_v52 = vadd.f32 1.0, %v2052_v48  ;;  %v2054_v59 = vpop.eup %2053 }
 0x157   : > { %v647_v53 = vmul.f32 %v646_v50, %v643_v49  ;;  %v2056_v60 = vpop.eup %2055  ;;  %v822_v62 = vadd.f32 1.0, %v2054_v59 }
 0x158   : > { %v739_v54 = vmul.f32 %v738_v52, %v735_v51  ;;  %v906_v2 = vadd.f32 1.0, %v2056_v60  ;;  %v2058_v11 = vpop.eup %2057 }
 0x159   : > { %1727 = vmatmul.mubr.msk.f32.vlgmr.msra.gmra.mrb[2].mxu0 %vm542_vm2, %v647_v53  ;;  %v823_v5 = vmul.f32 %v822_v62, %v819_v3  ;;  %v2060_v12 = vpop.eup %2059  ;;  %v990_v14 = vadd.f32 1.0, %v2058_v11  ;;  %v1359_v53 = vstv %s635_s6 }
 0x15a   : > { %1746 = vmatmul.mubr.msk.f32.vlgmr.msra.gmra.mrb[2].mxu1 %vm542_vm2, %v739_v54  ;;  %1900 = vmatpush3.bf16.msra.mxu0 %v2501_v19  ;;  %v907_v6 = vmul.f32 %v906_v2, %v903_v4  ;;  %v1074_v16 = vadd.f32 1.0, %v2060_v12  ;;  %v2062_v23 = vpop.eup %2061 }
 0x15b   : > { %1912 = vmatpush3.bf16.msra.mxu1 %v2501_v19  ;;  %1901 = vmatprep.subr.bf16.mxu0 %v2215_v0  ;;  %v991_v20 = vmul.f32 %v990_v14, %v987_v17  ;;  %v1158_v25 = vadd.f32 1.0, %v2062_v23 }
 0x15c   : > { %1913 = vmatprep.subr.bf16.mxu1 %v2215_v0  ;;  %1764 = vmatprep.mubr.msk.f32.mxu0 %vm2216_vm0, %v2217_v1  ;;  %v1075_v22 = vmul.f32 %v1074_v16, %v1071_v18 }
 0x15d   : > { %1783 = vmatprep.mubr.msk.f32.mxu1 %vm2216_vm0, %v2217_v1  ;;  %v1159_v28 = vmul.f32 %v1158_v25, %v1155_v26 }
 0x15e   : > { %1903 = vmatpush3.bf16.msra.mxu0 %v2508_v21 }
 0x15f   : > { %1915 = vmatpush3.bf16.msra.mxu1 %v2508_v21  ;;  %1904 = vmatprep.subr.bf16.mxu0 %v2215_v0 }
 0x160   : > { %1916 = vmatprep.subr.bf16.mxu1 %v2215_v0 }
 0x162   : > { %1906 = vmatpush3.bf16.msra.mxu0 %v2520_v24 }
 0x163   : > { %1918 = vmatpush3.bf16.msra.mxu1 %v2520_v24  ;;  %1907 = vmatprep.subr.bf16.mxu0 %v2215_v0 }
 0x164   : > { %1919 = vmatprep.subr.bf16.mxu1 %v2215_v0 }
 0x166   : > { %1909 = vmatpush3.bf16.msra.mxu0 %v2532_v27 }
 0x167   : > { %1921 = vmatpush3.bf16.msra.mxu1 %v2532_v27  ;;  %1922 = vmatprep.subr.bf16.mxu0 %v2215_v0 }
 0x168   : > { %1934 = vmatprep.subr.bf16.mxu1 %v2215_v0 }
 0x169   : > { %1765 = vmatmul.mubr.msk.f32.vlgmr.msra.gmra.mrb[4].mxu0 %vm542_vm2, %v823_v5 }
 0x16a   : > { %1784 = vmatmul.mubr.msk.f32.vlgmr.msra.gmra.mrb[4].mxu1 %vm542_vm2, %v907_v6  ;;  %1924 = vmatpush3.bf16.msra.mxu0 %v2501_v19 }
 0x16b   : > { %1936 = vmatpush3.bf16.msra.mxu1 %v2501_v19  ;;  %1925 = vmatprep.subr.bf16.mxu0 %v2215_v0 }
 0x16c   : > { %1937 = vmatprep.subr.bf16.mxu1 %v2215_v0  ;;  %1802 = vmatprep.mubr.msk.f32.mxu0 %vm2216_vm0, %v2217_v1 }
 0x16d   : > { %1821 = vmatprep.mubr.msk.f32.mxu1 %vm2216_vm0, %v2217_v1 }
 0x16e   : > { %1927 = vmatpush3.bf16.msra.mxu0 %v2508_v21 }
 0x16f   : > { %1939 = vmatpush3.bf16.msra.mxu1 %v2508_v21  ;;  %1928 = vmatprep.subr.bf16.mxu0 %v2215_v0 }
 0x170   : > { %1940 = vmatprep.subr.bf16.mxu1 %v2215_v0 }
 0x172   : > { %1930 = vmatpush3.bf16.msra.mxu0 %v2520_v24 }
 0x173   : > { %1942 = vmatpush3.bf16.msra.mxu1 %v2520_v24  ;;  %1931 = vmatprep.subr.bf16.mxu0 %v2215_v0 }
 0x174   : > { %1943 = vmatprep.subr.bf16.mxu1 %v2215_v0 }
 0x176   : > { %1933 = vmatpush3.bf16.msra.mxu0 %v2532_v27 }
 0x177   : > { %1945 = vmatpush3.bf16.msra.mxu1 %v2532_v27  ;;  %1946 = vmatprep.subr.bf16.mxu0 %v2215_v0 }
 0x178   : > { %1958 = vmatprep.subr.bf16.mxu1 %v2215_v0 }
 0x179   : > { %1803 = vmatmul.mubr.msk.f32.vlgmr.msra.gmra.mrb[6].mxu0 %vm542_vm2, %v991_v20 }
 0x17a   : > { %1822 = vmatmul.mubr.msk.f32.vlgmr.msra.gmra.mrb[6].mxu1 %vm542_vm2, %v1075_v22  ;;  %1948 = vmatpush3.bf16.msra.mxu0 %v2501_v19 }
 0x17b   : > { %1960 = vmatpush3.bf16.msra.mxu1 %v2501_v19  ;;  %1949 = vmatprep.subr.bf16.mxu0 %v2215_v0  ;;  %v2064_v19 = vpop.eup %2063 }
 0x17c   : > { %1961 = vmatprep.subr.bf16.mxu1 %v2215_v0  ;;  %1840 = vmatprep.mubr.msk.f32.mxu0 %vm2216_vm0, %v2217_v1 }
 0x17d   : > { %1859 = vmatprep.mubr.msk.f32.mxu1 %vm2216_vm0, %v2217_v1  ;;  %v1242_v1 = vadd.f32 1.0, %v2064_v19 }
 0x17e   : > { %1951 = vmatpush3.bf16.msra.mxu0 %v2508_v21 }
 0x17f   : > { %1963 = vmatpush3.bf16.msra.mxu1 %v2508_v21  ;;  %1952 = vmatprep.subr.bf16.mxu0 %v2215_v0  ;;  %v1239_v21 = vmul.f32 0.5, %v1238_v10 }
 0x180   : > { %1964 = vmatprep.subr.bf16.mxu1 %v2215_v0 }
 0x181   : > { %v1243_v29 = vmul.f32 %v1242_v1, %v1239_v21 }
 0x182   : > { %1954 = vmatpush3.bf16.msra.mxu0 %v2520_v24 }
 0x183   : > { %1966 = vmatpush3.bf16.msra.mxu1 %v2520_v24  ;;  %1955 = vmatprep.subr.bf16.mxu0 %v2215_v0 }
 0x184   : > { %1967 = vmatprep.subr.bf16.mxu1 %v2215_v0 }
 0x186   : > { %1957 = vmatpush3.bf16.msra.mxu0 %v2532_v27 }
 0x187   : > { %1969 = vmatpush3.bf16.msra.mxu1 %v2532_v27 }
 0x189   : > { %1841 = vmatmul.mubr.msk.f32.vlgmr.msra.gmra.mrb[8].mxu0 %vm542_vm2, %v1159_v28 }
 0x18a   : > { %1860 = vmatmul.mubr.msk.f32.vlgmr.msra.gmra.mrb[8].mxu1 %vm542_vm2, %v1243_v29 }
 0x22c   : > { %v725_v31 = vpop.f32.mrb[2].mxu0 }
 0x22d   : > { %v809_v24 = vpop.f32.mrb[2].mxu1  ;;  %v1728_v32 = vpop.f32.mrb[3].mxu0 }
 0x22e   : > { %1318 = vrot.lane.b32.xlu0 %v809_v24, %s2218_s27  ;;  %v1747_v33 = vpop.f32.mrb[3].mxu1  ;;  %s437_s27 = scalar_lea.vmem [#allocation10], %s2438_s21  ;;  %s1378_s21 = scalar_lea.sflag [#allocation7], %s2435_s17 }
 0x23c   : > { %v893_v0 = vpop.f32.mrb[4].mxu0 }
 0x23d   : > { %v977_v34 = vpop.f32.mrb[4].mxu1  ;;  %1322 = vrot.lane.b32.xlu0 %v893_v0, %s2219_s18  ;;  %v1766_v35 = vpop.f32.mrb[5].mxu0  ;;  %s1399_s18 = sshll.u32 %s437_s27, 4  ;;  %s2642_s18 = int_to_ptr.vmem [resolvable:$true] %s1399_s18 }
 0x23e   : > { %1326 = vrot.lane.b32.xlu1 %v977_v34, %s2220_s0  ;;  %v1785_v27 = vpop.f32.mrb[5].mxu1  ;;  %s2125_s29 = scalar_lea.vmem %s2642_s18, 128 }
 0x23f   : > { %p2126_p5 = scmp.ne.s32.totalorder %s2642_s18, %s2125_s29 }
 0x241   : > { %p2127_p4 = pnand %p2126_p5, %p2723_p7 }
 0x243   : > { %p2128_p10 = pneg %p2127_p4 }
 0x24c   : > { %v1061_v36 = vpop.f32.mrb[6].mxu0 }
 0x24d   : > { %v1145_v37 = vpop.f32.mrb[6].mxu1  ;;  %1330 = vrot.lane.b32.xlu1 %v1061_v36, %s2221_s28  ;;  %v1804_v38 = vpop.f32.mrb[7].mxu0 }
 0x24e   : > { %v1823_v39 = vpop.f32.mrb[7].mxu1  ;;  %1334 = vrot.lane.b32.xlu0 %v1145_v37, %s2222_s30  ;;  %s451_s30 = scalar_lea.vmem %s2699_s8, %s1581_s15 }
 0x25c   : > { %v1229_v40 = vpop.f32.mrb[8].mxu0 }
 0x25d   : > { %v1313_v41 = vpop.f32.mrb[8].mxu1  ;;  %1338 = vrot.lane.b32.xlu1 %v1229_v40, %s2223_s10  ;;  %v1842_v42 = vpop.f32.mrb[9].mxu0 }
 0x25e   : > { %v1861_v43 = vpop.f32.mrb[9].mxu1  ;;  %1342 = vrot.lane.b32.xlu0 %v1313_v41, %s2224_s22 }
 0x261   : > { %545 = vrot.lane.b32.xlu1 %v2543_v30, %s2225_s20  ;;  %s444_s20 = scalar_lea.vmem %s2698_s7, %s1581_s15  ;;  %s2227_s15 = smov [#allocation10]  }
 0x262   : > { %550 = vrot.lane.b32.xlu0 %v2543_v30, %s2226_s26  ;;  %s2129_s19 = sshll.u32 %s2227_s15, 4  ;;  %s2130_s19 = int_to_ptr.vmem [resolvable:$false] %s2129_s19 }
 0x263   : > { %s2131_s0 = scalar_lea.vmem %s2130_s19, 256  ;;  %p2132_p12 = scmp.lt.s32.totalorder %s2642_s18, %s2130_s19 }
 0x264   : > { %p2133_p1 = scmp.lt.s32.totalorder %s2131_s0, %s2125_s29 }
 0x266   : > { %p2134_p2 = por %p2133_p1, %p2132_p12 }
 0x268   : > { %p2135_p9 = pnand %p2134_p2, %p2128_p10 }
 0x2a0   : > { %v1319_v44 = vpop.permute.xlu0 %1318 }
 0x2a1   : > { %v1346_v47 = vsel %vm548_vm3, %v725_v31, %v1319_v44 }
 0x2af   : > { %v1323_v46 = vpop.permute.xlu0 %1322 }
 0x2b0   : > { %v1327_v45 = vpop.permute.xlu1 %1326  ;;  %v1348_v48 = vsel %vm1347_vm4, %v1346_v47, %v1323_v46 }
 0x2b1   : > { %v1350_v50 = vsel %vm1349_vm5, %v1348_v48, %v1327_v45 }
 0x2bf   : > { %v1331_v49 = vpop.permute.xlu1 %1330 }
 0x2c0   : > { %v1335_v51 = vpop.permute.xlu0 %1334  ;;  %v1352_v52 = vsel %vm1351_vm6, %v1350_v50, %v1331_v49 }
 0x2c1   : > { %v1354_v30 = vsel %vm1353_vm7, %v1352_v52, %v1335_v51 }
 0x2cf   : > { %v1339_v54 = vpop.permute.xlu1 %1338 }
 0x2d0   : > { %v1343_v55 = vpop.permute.xlu0 %1342  ;;  %v1356_v56 = vsel %vm1355_vm8, %v1354_v30, %v1339_v54 }
 0x2d1   : > { %v1358_v57 = vsel %vm1357_vm9, %v1356_v56, %v1343_v55 }
 0x2d2   : > { %v1360_v58 = vadd.f32 %v1359_v53, %v1358_v57 }
 0x2d3   : > { %v546_v59 = vpop.permute.xlu1 %545 }
 0x2d4   : > { %v551_v60 = vpop.permute.xlu0 %550  ;;  %549 = vst.msk [vmem:[%s444_s20] sm:$0xff] %vm548_vm3, %v546_v59 }
 0x2d5   : > { %1362 = vst.msk [vmem:[%s437_s27] sm:$0xff] %vm1361_vm10, %v1360_v58 }
 0x2d6   : > { %553 = vst.msk [vmem:[%s451_s30] sm:$0xff] %vm548_vm3, %v551_v60 }
 0x2d7   : > { %2138 = shalt.err (!%p2135_p9)
}
 0x2d8   : > { %s2139_s17 = scalar_lea.hbm %s2640_s14, 128  ;;  %s2143_s30 = scalar_lea.hbm %s2700_s9, 256 }
 0x2d9   : > { %p2140_p11 = scmp.ne.s32.totalorder %s2640_s14, %s2139_s17  ;;  %p2144_p13 = scmp.lt.u32.totalorder %s2640_s14, %s2700_s9 }
 0x2da   : > { %p2145_p8 = scmp.lt.u32.totalorder %s2143_s30, %s2139_s17  ;;  %p2147_p5 = scmp.lt.u32.totalorder %s2139_s17, %s2640_s14 }
 0x2db   : > { %p2141_p3 = pnand %p2140_p11, %p2723_p7 }
 0x2dc   : > { %p2146_p0 = por %p2145_p8, %p2144_p13 }
 0x2dd   : > { %p2142_p6 = pneg %p2141_p3 }
 0x2de   : > { %p2148_p4 = por %p2147_p5, %p2146_p0 }
 0x2e0   : > { %p2149_p10 = pnand %p2148_p4, %p2142_p6 }
 0x2e2   : > { %2152 = shalt.err (!%p2149_p10)
}
 0x2e3   : > { %1974 = dma.vmem_to_hbm [thread:$0]  (%p2723_p7), %s2642_s18, 128, %s2640_s14, %s1378_s21  }
 0x2e4 PF: > { %s1431_s20 = sand.u32 1, %s2191_s11   ;;  %p2724_p12 = scmp.ne.s32.totalorder %s2713_s25, 0 }
 0x2e5   : > { %p2725_p1 = scmp.ge.s32.totalorder %s2211_s16, 2  ;;  %s1432_s26 = scalar_lea.sflag [#allocation7], %s1431_s20 }
 0x2e7   : > { %p1984_p2 = pnand %p2725_p1, %p2724_p12 }
 0x2e9   : > { %2186 = dma.done.wait (!%p1984_p2), %s1432_s26, 128  }
 0x2ea   : > { %2188 = vsyncadd (!%p1984_p2), %s1432_s26, 4294967168  ;;  %s30_s16 = sadd.s32 1, %s2211_s16   ;;  %s2726_s14 = sld [smem:[#allocation14_spill]] }
 0x2eb   : > { %p27_p9 = scmp.ge.s32.totalorder %s30_s16, 4   ;;  %s2727_s15 = sld [smem:[#allocation15_spill]] }
 0x2ec   : > { %s2728_s11 = smov %s2195_s12  ;;  %s2729_s12 = smov %s2199_s13 }
 0x2ed   : > { %s2730_s13 = smov %s2337_s24  ;;  %29 = sbr.rel (!%p27_p9) target bundleno = 11 (0xb), region = 134 }
 0x2f4   :  { %1437 = vsyncpa [#allocation6], 1 }
 0x2f5   :  { %1439 = vsyncpa [#allocation6 + $0x1], 1 }
 0x2f6   :  { %1440 = vsyncpa [#allocation9], 1 }
 0x2f7   :  { %1442 = vsyncpa [#allocation9 + $0x1], 1 }
 0x2f8   :  { %1443 = vsyncpa [#allocation7], 1 }
 0x2f9   :  { %1445 = vsyncpa [#allocation7 + $0x1], 1 }

// kernel: tpu_custom_call.1
= control target key start
LH: loop header
LB: loop body
LE: loop exit
PB: predicated region body
PF: predicated region fallthrough
CT: control target
= control target key end

     0   :  { %s2691_s0 = inlined_call_operand.hbm [shape: f32[2,8,32], index: 0, kind: input, shape index: {}]   ;;  %s2692_s1 = inlined_call_operand.hbm [shape: f32[2,8,32], index: 1, kind: input, shape index: {}]   ;;  %s2693_s2 = inlined_call_operand.vmem [shape: f32[32,66], index: 2, kind: input, shape index: {}]   ;;  %s2694_s3 = inlined_call_operand.vmem [shape: f32[1,66], index: 3, kind: input, shape index: {}]   ;;  %s2695_s4 = inlined_call_operand.vmem [shape: f32[32,64], index: 4, kind: input, shape index: {}]   ;;  %s2696_s5 = inlined_call_operand.vmem [shape: f32[64,1], index: 5, kind: input, shape index: {}]   ;;  %s2697_s6 = inlined_call_operand.<no memory space> [shape: f32[1], index: 6, kind: input, shape index: {}]   ;;  %s2698_s7 = inlined_call_operand.vmem [shape: f32[2,8,1], index: 7, kind: output, shape index: {0}]   ;;  %s2699_s8 = inlined_call_operand.vmem [shape: f32[2,8,1], index: 8, kind: output, shape index: {1}]   ;;  %s2700_s9 = inlined_call_operand.hbm [shape: f32[2,8,8], index: 9, kind: output, shape index: {2}]  }
   0x1   :  { %2707 = sst [smem:[#allocation16_spill]] %s2691_s0 }
   0x2   :  { %15 = sst [smem:[#allocation4]] %s2697_s6 }
   0x3   :  { %16 = vsyncpa [#allocation6], 0 }
   0x4   :  { %18 = vsyncpa [#allocation6 + $0x1], 0 }
   0x5   :  { %19 = vsyncpa [#allocation9], 0 }
   0x6   :  { %21 = vsyncpa [#allocation9 + $0x1], 0 }
   0x7   :  { %22 = vsyncpa [#allocation7], 0 }
   0x8   :  { %24 = vsyncpa [#allocation7 + $0x1], 0  ;;  %s2281_s11 = smov 0   ;;  %s2283_s12 = smov 0  }
   0x9   :  { %s2285_s13 = smov 0   ;;  %s2287_s14 = smov 0  }
   0xa   :  { %s2289_s15 = smov 0   ;;  %s2291_s16 = smov 0  }
   0xb LB: > { %2708 = sst [smem:[#allocation14_spill]] %s2207_s15  ;;  %s1569_s6 = sadd.s32 4294967295, %s2211_s16   ;;  %s2211_s16 = sphi %s2291_s16, %s30_s16   ;;  %s2207_s15 = sphi %s2289_s15, %s2727_s15   ;;  %s2203_s14 = sphi %s2287_s14, %s2726_s14   ;;  %s2199_s13 = sphi %s2285_s13, %s2730_s13   ;;  %s2195_s12 = sphi %s2283_s12, %s2729_s12   ;;  %s2191_s11 = sphi %s2281_s11, %s2728_s11  }
   0xc   : > { %s1570_s17 = sadd.s32 4294967294, %s2211_s16   ;;  %s49_s18 = sadd.s32 1, %s2207_s15 }
   0xd   : > { %s58_s19 = sadd.s32 1, %s2199_s13  ;;  %p51_p0 = scmp.ge.s32.totalorder %s49_s18, 2 }
   0xe   : > { %p65_p1 = scmp.ne.s32.totalorder %s2199_s13, %s2195_s12  ;;  %p66_p2 = scmp.eq.s32.totalorder %s2211_s16, 0 }
   0xf   : > { %p71_p3 = scmp.ne.s32.totalorder %s2195_s12, %s2191_s11  ;;  %s2732_s18 = smov (%p51_p0, %s49_s18), 0 }
  0x10   : > { %2709 = sst [smem:[#allocation15_spill]] %s2732_s18  ;;  %p2322_p4 = por %p66_p2, %p65_p1 }
  0x11   : > { %p72_p5 = scmp.eq.s32.totalorder %s1569_s6, 0  ;;  %s53_s21 = ssub.s32 %s2207_s15, %s2732_s18 }
  0x12   : > { %p288_p6 = scmp.eq.s32.totalorder %s1569_s6, 1  ;;  %p56_p7 = scmp.eq.s32.totalorder %s53_s21, 0 }
  0x13   : > { %p2328_p8 = por %p72_p5, %p71_p3  ;;  %p294_p10 = scmp.eq.s32.totalorder %s1570_s17, 1 }
  0x14   : > { %p2332_p9 = por %p288_p6, %p65_p1  ;;  %p1987_p13 = scmp.lt.s32.totalorder %s2211_s16, 2 }
  0x15   : > { %s2711_s22 = scalar_select %p2328_p8, 1, 0 }
  0x16   : > { %s2712_s23 = scalar_select %p2332_p9, 1, 0 }
  0x17   : > { %s2337_s24 = scalar_select %p56_p7, %s2199_s13, %s58_s19  }
  0x18   : > { %p2339_p11 = por %p294_p10, %p71_p3  ;;  %s2346_s26 = sand.u32 1, %s2199_s13  }
  0x19   : > { %s2701_s27 = sshll.u32 %s2346_s26, 3  ;;  %s2702_s28 = sshll.u32 %s2207_s15, 7 }
  0x1a   : > { %s2713_s25 = scalar_select %p2339_p11, 1, 0 }
  0x1b   : > { %s2714_s0 = sld [smem:[#allocation16_spill]]  ;;  %s333_s6 = scalar_lea.vmem [#allocation5], %s2701_s27 }
  0x1c   : > { %s341_s17 = sshll.u32 %s333_s6, 4  ;;  %p2363_p0 = pnand %p1987_p13, %p2322_p4  ;;  %s2359_s17 = int_to_ptr.vmem [resolvable:$true] %s341_s17 }
  0x1d   : > { %s330_s21 = scalar_lea.sflag [#allocation6], %s2346_s26 }
  0x1e   : > { %p2067_p5 = pneg %p2363_p0 }
  0x21   : > { %s2355_s10 = scalar_lea.hbm %s2714_s0, %s2702_s28  ;;  %s2070_s20 = scalar_lea.hbm %s2714_s0, 256 }
  0x22   : > { %s2065_s29 = scalar_lea.hbm %s2355_s10, 128  ;;  %p2071_p4 = scmp.lt.u32.totalorder %s2355_s10, %s2714_s0 }
  0x23   : > { %p2066_p3 = scmp.ne.s32.totalorder %s2355_s10, %s2065_s29  ;;  %p2072_p10 = scmp.lt.u32.totalorder %s2070_s20, %s2065_s29 }
  0x24   : > { %p2074_p12 = scmp.lt.u32.totalorder %s2065_s29, %s2355_s10 }
  0x25   : > { %p2068_p6 = pnand %p2067_p5, %p2066_p3  ;;  %p2073_p13 = por %p2072_p10, %p2071_p4 }
  0x27   : > { %p2069_p7 = pneg %p2068_p6  ;;  %p2075_p1 = por %p2074_p12, %p2073_p13 }
  0x29   : > { %p2076_p2 = pnand %p2075_p1, %p2069_p7 }
  0x2b   : > { %2079 = shalt.err (!%p2076_p2)
}
  0x2c   : > { %s2080_s18 = scalar_lea.vmem %s2359_s17, 128  ;;  %s2213_s30 = smov [#allocation5]  }
  0x2d   : > { %p2081_p3 = scmp.ne.s32.totalorder %s2359_s17, %s2080_s18  ;;  %s2085_s6 = sshll.u32 %s2213_s30, 4  ;;  %s2086_s6 = int_to_ptr.vmem [resolvable:$false] %s2085_s6 }
  0x2e   : > { %s2087_s27 = scalar_lea.vmem %s2086_s6, 256  ;;  %p2088_p9 = scmp.lt.s32.totalorder %s2359_s17, %s2086_s6 }
  0x2f   : > { %p2083_p6 = pnand %p2081_p3, %p2067_p5  ;;  %p2089_p4 = scmp.lt.s32.totalorder %s2087_s27, %s2080_s18 }
  0x31   : > { %p2084_p11 = pneg %p2083_p6  ;;  %p2090_p10 = por %p2089_p4, %p2088_p9 }
  0x33   : > { %p2091_p12 = pnand %p2090_p10, %p2084_p11 }
  0x35   : > { %2094 = shalt.err (!%p2091_p12)
}
  0x36   : > { %1979 = dma.hbm_to_vmem [thread:$0]  (!%p2363_p0), %s2355_s10, 128, %s2359_s17, %s330_s21  }
  0x37   : > { %p2716_p1 = scmp.lt.s32.totalorder %s2211_s16, 3  ;;  %p2717_p2 = scmp.ge.s32.totalorder %s2211_s16, 1 }
  0x38   : > { %s2719_s18 = sshll.u32 %s2207_s15, 7  ;;  %s2720_s6 = sshll.u32 %s2346_s26, 3 }
  0x39   : > { %p2399_p7 = pnand %p2717_p2, %p2716_p1  ;;  %s2408_s30 = scalar_lea.hbm %s2692_s1, %s2719_s18 }
  0x3a   : > { %s352_s27 = scalar_lea.vmem [#allocation8], %s2720_s6  ;;  %s349_s10 = scalar_lea.sflag [#allocation9], %s2346_s26 }
  0x3b   : > { %s2718_s28 = scalar_select %p2399_p7, 1, 0 }
  0x3c   : > { %s360_s0 = sshll.u32 %s352_s27, 4  ;;  %s2095_s17 = scalar_lea.hbm %s2408_s30, 128  ;;  %s361_s0 = int_to_ptr.vmem [resolvable:$true] %s360_s0 }
  0x3d   : > { %p2096_p9 = scmp.ne.s32.totalorder %s2408_s30, %s2095_s17  ;;  %s2100_s18 = scalar_lea.hbm %s2692_s1, 256 }
  0x3e   : > { %p2101_p3 = scmp.lt.u32.totalorder %s2408_s30, %s2692_s1  ;;  %p2102_p6 = scmp.lt.u32.totalorder %s2100_s18, %s2095_s17 }
  0x3f   : > { %p2098_p11 = pnand %p2096_p9, %p2067_p5  ;;  %p2104_p10 = scmp.lt.u32.totalorder %s2095_s17, %s2408_s30 }
  0x40   : > { %p2103_p4 = por %p2102_p6, %p2101_p3 }
  0x41   : > { %p2099_p13 = pneg %p2098_p11 }
  0x42   : > { %p2105_p12 = por %p2104_p10, %p2103_p4 }
  0x44   : > { %p2106_p1 = pnand %p2105_p12, %p2099_p13 }
  0x46   : > { %2109 = shalt.err (!%p2106_p1)
}
  0x47   : > { %s2110_s26 = scalar_lea.vmem %s361_s0, 128  ;;  %s2214_s6 = smov [#allocation8]  }
  0x48   : > { %p2111_p2 = scmp.ne.s32.totalorder %s361_s0, %s2110_s26  ;;  %s2115_s15 = sshll.u32 %s2214_s6, 4  ;;  %s2116_s15 = int_to_ptr.vmem [resolvable:$false] %s2115_s15 }
  0x49   : > { %s2117_s27 = scalar_lea.vmem %s2116_s15, 256  ;;  %p2118_p8 = scmp.lt.s32.totalorder %s361_s0, %s2116_s15 }
  0x4a   : > { %p2113_p9 = pnand %p2111_p2, %p2067_p5  ;;  %p2119_p7 = scmp.lt.s32.totalorder %s2117_s27, %s2110_s26 }
  0x4c   : > { %p2114_p11 = pneg %p2113_p9  ;;  %p2120_p3 = por %p2119_p7, %p2118_p8 }
  0x4e   : > { %p2121_p6 = pnand %p2120_p3, %p2114_p11 }
  0x50   : > { %2124 = shalt.err (!%p2121_p6)
}
  0x51   : > { %1982 = dma.hbm_to_vmem [thread:$0]  (!%p2363_p0), %s2408_s30, 128, %s361_s0, %s349_s10  }
  0x52   : > { %p2721_p13 = scmp.ne.s32.totalorder %s2718_s28, 0 }
  0x53   : > { %s2435_s17 = sand.u32 (!%p2721_p13), 1, %s2195_s12   ;;  %p2722_p8 = scmp.ne.s32.totalorder (!%p2721_p13), %s2711_s22, 0 }
  0x54   : > { %369 = sbr.rel (%p2721_p13) target bundleno = 740 (0x2e4), region = 48  ;;  %s2438_s21 = sshll.u32 (!%p2721_p13), %s2435_s17, 3 }
  0x55   : > { %s372_s18 = scalar_lea.sflag (!%p2721_p13), [#allocation6], %s2435_s17  ;;  %s375_s29 = scalar_lea.vmem (!%p2721_p13), [#allocation5], %s2438_s21 }
  0x5b   : > { %2178 = dma.done.wait (%p2722_p8), %s372_s18, 128  }
  0x5c   : > { %2180 = vsyncadd (%p2722_p8), %s372_s18, 4294967168  ;;  %s381_s0 = scalar_lea.sflag [#allocation9], %s2435_s17  ;;  %s384_s19 = scalar_lea.vmem [#allocation8], %s2438_s21 }
  0x5d   : > { %2182 = dma.done.wait (%p2722_p8), %s381_s0, 128  }
  0x5e   : > { %2184 = vsyncadd (%p2722_p8), %s381_s0, 4294967168  ;;  %v2215_v0 = vmov 0.0|0.0   ;;  %vm2216_vm0 = vmmov 0   ;;  %v2217_v1 = vmov 0.0   ;;  %v457_v2 = vld [vmem:[%s2693_s2] sm:$0xff]  ;;  %v458_v3 = vld [vmem:[%s2693_s2 + $0x8] sm:$0xff] }
  0x5f   : > { %1862 = vmatprep.subr.bf16.mxu0 %v2215_v0  ;;  %1868 = vmatprep.subr.bf16.mxu1 %v2215_v0  ;;  %v555_v4 = vld [vmem:[%s2695_s4] sm:$0xff]  ;;  %v1863_v5 = vpack.c.bf16 %v458_v3, %v457_v2  ;;  %v556_v6 = vld [vmem:[%s2695_s4 + $0x8] sm:$0xff]  ;;  %v459_v7 = vld [vmem:[%s2693_s2 + $0x10] sm:$0xff]  ;;  %vm468_vm1 = vcmask 261120   ;;  %vm542_vm2 = vcmask 523264   ;;  %s2218_s27 = smov 1  }
  0x60   : > { %1696 = vmatprep.mubr.msk.f32.mxu0 %vm2216_vm0, %v2217_v1  ;;  %1707 = vmatprep.mubr.msk.f32.mxu1 %vm2216_vm0, %v2217_v1  ;;  %v460_v8 = vld [vmem:[%s2693_s2 + $0x18] sm:$0xff]  ;;  %v1869_v9 = vpack.c.bf16 %v556_v6, %v555_v4  ;;  %v557_v10 = vld [vmem:[%s2695_s4 + $0x10] sm:$0xff]  ;;  %v554_v15 = vld [vmem:[%s384_s19] sm:$0xff]  ;;  %s2219_s18 = smov 2   ;;  %s2220_s0 = smov 3   ;;  %vm548_vm3 = vcmask 7168  }
  0x61   : > { %v558_v11 = vld [vmem:[%s2695_s4 + $0x18] sm:$0xff]  ;;  %1864 = vmatpush3.bf16.msra.mxu0 %v1863_v5  ;;  %v1866_v12 = vpack.c.bf16 %v460_v8, %v459_v7  ;;  %v648_v16 = vld [vmem:[%s2696_s5] sm:$0xff]  ;;  %v649_v17 = vld [vmem:[%s2696_s5 + $0x8] sm:$0xff]  ;;  %s2221_s28 = smov 4   ;;  %s2222_s30 = smov 5   ;;  %vm1347_vm4 = vcmask 15360  }
  0x62   : > { %1870 = vmatpush3.bf16.msra.mxu1 %v1869_v9  ;;  %1865 = vmatprep.subr.bf16.mxu0 %v2215_v0  ;;  %v1872_v13 = vpack.c.bf16 %v558_v11, %v557_v10  ;;  %v456_v14 = vld [vmem:[%s375_s29] sm:$0xff]  ;;  %v2501_v19 = vpack.c.bf16 %v649_v17, %v648_v16  ;;  %v652_v22 = vld [vmem:[%s2696_s5 + $0x20] sm:$0xff]  ;;  %v653_v23 = vld [vmem:[%s2696_s5 + $0x28] sm:$0xff]  ;;  %s2223_s10 = smov 6   ;;  %s2224_s22 = smov 7   ;;  %vm1349_vm5 = vcmask 23552  }
  0x63   : > { %1871 = vmatprep.subr.bf16.mxu1 %v2215_v0  ;;  %v650_v18 = vld [vmem:[%s2696_s5 + $0x10] sm:$0xff]  ;;  %v651_v20 = vld [vmem:[%s2696_s5 + $0x18] sm:$0xff]  ;;  %v2520_v24 = vpack.c.bf16 %v653_v23, %v652_v22  ;;  %v1583_v28 = vld [vmem:[%s2694_s3] ss:$0 sm:$0xff]  ;;  %s2225_s20 = smov 64   ;;  %s2226_s26 = smov 63  }
  0x64   : > { %v2508_v21 = vpack.c.bf16 %v651_v20, %v650_v18  ;;  %v654_v25 = vld [vmem:[%s2696_s5 + $0x30] sm:$0xff]  ;;  %v655_v26 = vld [vmem:[%s2696_s5 + $0x38] sm:$0xff]  ;;  %p438_p0 = scmp.lt.s32.totalorder %s2203_s14, 1  ;;  %s635_s6 = sld [smem:[#allocation4]]  ;;  %vm1351_vm6 = vcmask 31744   ;;  %vm1353_vm7 = vcmask 39936  }
  0x65   : > { %1867 = vmatpush3.bf16.msra.mxu0 %v1866_v12  ;;  %v2532_v27 = vpack.c.bf16 %v655_v26, %v654_v25  ;;  %vm1355_vm8 = vcmask 48128   ;;  %vm1357_vm9 = vcmask 56320   ;;  %s1603_s19 = sshll.u32 %s2203_s14, 7  ;;  %vm1361_vm10 = vcmask 64512   ;;  %p2723_p7 = scmp.ne.s32.totalorder %s2712_s23, 0 }
  0x66   : > { %1873 = vmatpush3.bf16.msra.mxu1 %v1872_v13  ;;  %1874 = vmatprep.subr.bf16.mxu0 %v2215_v0  ;;  %s439_s29 = scalar_select %p438_p0, %s2203_s14, 1 }
  0x67   : > { %1886 = vmatprep.subr.bf16.mxu1 %v2215_v0  ;;  %s2640_s14 = scalar_lea.hbm %s2700_s9, %s1603_s19 }
  0x68   : > { %1697 = vmatmul.mubr.msk.f32.vlgmr.msra.gmra.mrb[0].mxu0 %vm468_vm1, %v456_v14  ;;  %s1581_s15 = sshll.u32 %s439_s29, 3 }
  0x69   : > { %1708 = vmatmul.mubr.msk.f32.vlgmr.msra.gmra.mrb[0].mxu1 %vm468_vm1, %v554_v15  ;;  %1726 = vmatprep.mubr.msk.f32.mxu0 %vm2216_vm0, %v2217_v1 }
  0x6a   : > { %1745 = vmatprep.mubr.msk.f32.mxu1 %vm2216_vm0, %v2217_v1  ;;  %1876 = vmatpush3.bf16.msra.mxu0 %v2501_v19 }
  0x6b   : > { %1888 = vmatpush3.bf16.msra.mxu1 %v2501_v19  ;;  %1877 = vmatprep.subr.bf16.mxu0 %v2215_v0 }
  0x6c   : > { %1889 = vmatprep.subr.bf16.mxu1 %v2215_v0 }
  0x6e   : > { %1879 = vmatpush3.bf16.msra.mxu0 %v2508_v21 }
  0x6f   : > { %1891 = vmatpush3.bf16.msra.mxu1 %v2508_v21  ;;  %1880 = vmatprep.subr.bf16.mxu0 %v2215_v0 }
  0x70   : > { %1892 = vmatprep.subr.bf16.mxu1 %v2215_v0 }
  0x72   : > { %1882 = vmatpush3.bf16.msra.mxu0 %v2520_v24 }
  0x73   : > { %1894 = vmatpush3.bf16.msra.mxu1 %v2520_v24  ;;  %1883 = vmatprep.subr.bf16.mxu0 %v2215_v0 }
  0x74   : > { %1895 = vmatprep.subr.bf16.mxu1 %v2215_v0 }
  0x76   : > { %1885 = vmatpush3.bf16.msra.mxu0 %v2532_v27 }
  0x77   : > { %1897 = vmatpush3.bf16.msra.mxu1 %v2532_v27  ;;  %1898 = vmatprep.subr.bf16.mxu0 %v2215_v0 }
  0x78   : > { %1910 = vmatprep.subr.bf16.mxu1 %v2215_v0 }
 0x13b   : > { %v538_v29 = vpop.f32.mrb[0].mxu0 }
 0x13c   : > { %v2543_v30 = vadd.f32 %v1583_v28, %v538_v29  ;;  %v1698_v31 = vpop.f32.mrb[1].mxu0  ;;  %v629_v32 = vpop.f32.mrb[0].mxu1 }
 0x13d   : > { %634 = vst.msk [vmem:[#allocation3] sm:$0xff] %vm542_vm2, %v629_v32  ;;  %v1709_v33 = vpop.f32.mrb[1].mxu1 }
 0x13e   : > { %543 = vst.msk [vmem:[#allocation2] sm:$0xff] %vm542_vm2, %v2543_v30 }
 0x144   : > { %v1586_v34 = vld [vmem:[#allocation3] ss:$0 sm:$0xff]  ;;  %v1588_v35 = vld [vmem:[#allocation3 + $0x1] ss:$0 sm:$0xff]  ;;  %v1590_v41 = vld [vmem:[#allocation3 + $0x2] ss:$0 sm:$0xff] }
 0x145   : > { %v2548_v36 = vld [vmem:[#allocation2] sm:$0xff]  ;;  %v1592_v42 = vld [vmem:[#allocation3 + $0x3] ss:$0 sm:$0xff]  ;;  %v1594_v55 = vld [vmem:[#allocation3 + $0x4] ss:$0 sm:$0xff] }
 0x146   : > { %v642_v37 = vadd.f32 %v1586_v34, %v2548_v36  ;;  %v734_v38 = vadd.f32 %v1588_v35, %v2548_v36  ;;  %v818_v43 = vadd.f32 %v1590_v41, %v2548_v36  ;;  %v902_v44 = vadd.f32 %v1592_v42, %v2548_v36  ;;  %v1596_v56 = vld [vmem:[#allocation3 + $0x5] ss:$0 sm:$0xff]  ;;  %v1598_v7 = vld [vmem:[#allocation3 + $0x6] ss:$0 sm:$0xff]  ;;  %v1600_v8 = vld [vmem:[#allocation3 + $0x7] ss:$0 sm:$0xff] }
 0x147   : > { %v986_v57 = vadd.f32 %v1594_v55, %v2548_v36  ;;  %v1070_v58 = vadd.f32 %v1596_v56, %v2548_v36  ;;  %v1154_v9 = vadd.f32 %v1598_v7, %v2548_v36  ;;  %v1238_v10 = vadd.f32 %v1600_v8, %v2548_v36 }
 0x148   : > { %v644_v39 = vmul.f32 0.70710677, %v642_v37  ;;  %v736_v40 = vmul.f32 0.70710677, %v734_v38  ;;  %v820_v45 = vmul.f32 0.70710677, %v818_v43 }
 0x149   : > { %v904_v46 = vmul.f32 0.70710677, %v902_v44  ;;  %v643_v49 = vmul.f32 0.5, %v642_v37  ;;  %v735_v51 = vmul.f32 0.5, %v734_v38  ;;  %v988_v61 = vmul.f32 0.70710677, %v986_v57 }
 0x14a   : > { %2049 = verf.f32 %v644_v39  ;;  %v1072_v63 = vmul.f32 0.70710677, %v1070_v58  ;;  %v819_v3 = vmul.f32 0.5, %v818_v43  ;;  %v903_v4 = vmul.f32 0.5, %v902_v44 }
 0x14b   : > { %2051 = verf.f32 %v736_v40  ;;  %v1156_v13 = vmul.f32 0.70710677, %v1154_v9  ;;  %v1240_v15 = vmul.f32 0.70710677, %v1238_v10  ;;  %v987_v17 = vmul.f32 0.5, %v986_v57 }
 0x14c   : > { %2053 = verf.f32 %v820_v45  ;;  %v1071_v18 = vmul.f32 0.5, %v1070_v58  ;;  %v1155_v26 = vmul.f32 0.5, %v1154_v9 }
 0x14d   : > { %2055 = verf.f32 %v904_v46 }
 0x14e   : > { %2057 = verf.f32 %v988_v61 }
 0x14f   : > { %2059 = verf.f32 %v1072_v63 }
 0x150   : > { %2061 = verf.f32 %v1156_v13 }
 0x151   : > { %2063 = verf.f32 %v1240_v15 }
 0x154   : > { %v2050_v47 = vpop.eup %2049 }
 0x155   : > { %v2052_v48 = vpop.eup %2051  ;;  %v646_v50 = vadd.f32 1.0, %v2050_v47 }
 0x156   : > { %v738_v52 = vadd.f32 1.0, %v2052_v48  ;;  %v2054_v59 = vpop.eup %2053 }
 0x157   : > { %v647_v53 = vmul.f32 %v646_v50, %v643_v49  ;;  %v2056_v60 = vpop.eup %2055  ;;  %v822_v62 = vadd.f32 1.0, %v2054_v59 }
 0x158   : > { %v739_v54 = vmul.f32 %v738_v52, %v735_v51  ;;  %v906_v2 = vadd.f32 1.0, %v2056_v60  ;;  %v2058_v11 = vpop.eup %2057 }
 0x159   : > { %1727 = vmatmul.mubr.msk.f32.vlgmr.msra.gmra.mrb[2].mxu0 %vm542_vm2, %v647_v53  ;;  %v823_v5 = vmul.f32 %v822_v62, %v819_v3  ;;  %v2060_v12 = vpop.eup %2059  ;;  %v990_v14 = vadd.f32 1.0, %v2058_v11  ;;  %v1359_v53 = vstv %s635_s6 }
 0x15a   : > { %1746 = vmatmul.mubr.msk.f32.vlgmr.msra.gmra.mrb[2].mxu1 %vm542_vm2, %v739_v54  ;;  %1900 = vmatpush3.bf16.msra.mxu0 %v2501_v19  ;;  %v907_v6 = vmul.f32 %v906_v2, %v903_v4  ;;  %v1074_v16 = vadd.f32 1.0, %v2060_v12  ;;  %v2062_v23 = vpop.eup %2061 }
 0x15b   : > { %1912 = vmatpush3.bf16.msra.mxu1 %v2501_v19  ;;  %1901 = vmatprep.subr.bf16.mxu0 %v2215_v0  ;;  %v991_v20 = vmul.f32 %v990_v14, %v987_v17  ;;  %v1158_v25 = vadd.f32 1.0, %v2062_v23 }
 0x15c   : > { %1913 = vmatprep.subr.bf16.mxu1 %v2215_v0  ;;  %1764 = vmatprep.mubr.msk.f32.mxu0 %vm2216_vm0, %v2217_v1  ;;  %v1075_v22 = vmul.f32 %v1074_v16, %v1071_v18 }
 0x15d   : > { %1783 = vmatprep.mubr.msk.f32.mxu1 %vm2216_vm0, %v2217_v1  ;;  %v1159_v28 = vmul.f32 %v1158_v25, %v1155_v26 }
 0x15e   : > { %1903 = vmatpush3.bf16.msra.mxu0 %v2508_v21 }
 0x15f   : > { %1915 = vmatpush3.bf16.msra.mxu1 %v2508_v21  ;;  %1904 = vmatprep.subr.bf16.mxu0 %v2215_v0 }
 0x160   : > { %1916 = vmatprep.subr.bf16.mxu1 %v2215_v0 }
 0x162   : > { %1906 = vmatpush3.bf16.msra.mxu0 %v2520_v24 }
 0x163   : > { %1918 = vmatpush3.bf16.msra.mxu1 %v2520_v24  ;;  %1907 = vmatprep.subr.bf16.mxu0 %v2215_v0 }
 0x164   : > { %1919 = vmatprep.subr.bf16.mxu1 %v2215_v0 }
 0x166   : > { %1909 = vmatpush3.bf16.msra.mxu0 %v2532_v27 }
 0x167   : > { %1921 = vmatpush3.bf16.msra.mxu1 %v2532_v27  ;;  %1922 = vmatprep.subr.bf16.mxu0 %v2215_v0 }
 0x168   : > { %1934 = vmatprep.subr.bf16.mxu1 %v2215_v0 }
 0x169   : > { %1765 = vmatmul.mubr.msk.f32.vlgmr.msra.gmra.mrb[4].mxu0 %vm542_vm2, %v823_v5 }
 0x16a   : > { %1784 = vmatmul.mubr.msk.f32.vlgmr.msra.gmra.mrb[4].mxu1 %vm542_vm2, %v907_v6  ;;  %1924 = vmatpush3.bf16.msra.mxu0 %v2501_v19 }
 0x16b   : > { %1936 = vmatpush3.bf16.msra.mxu1 %v2501_v19  ;;  %1925 = vmatprep.subr.bf16.mxu0 %v2215_v0 }
 0x16c   : > { %1937 = vmatprep.subr.bf16.mxu1 %v2215_v0  ;;  %1802 = vmatprep.mubr.msk.f32.mxu0 %vm2216_vm0, %v2217_v1 }
 0x16d   : > { %1821 = vmatprep.mubr.msk.f32.mxu1 %vm2216_vm0, %v2217_v1 }
 0x16e   : > { %1927 = vmatpush3.bf16.msra.mxu0 %v2508_v21 }
 0x16f   : > { %1939 = vmatpush3.bf16.msra.mxu1 %v2508_v21  ;;  %1928 = vmatprep.subr.bf16.mxu0 %v2215_v0 }
 0x170   : > { %1940 = vmatprep.subr.bf16.mxu1 %v2215_v0 }
 0x172   : > { %1930 = vmatpush3.bf16.msra.mxu0 %v2520_v24 }
 0x173   : > { %1942 = vmatpush3.bf16.msra.mxu1 %v2520_v24  ;;  %1931 = vmatprep.subr.bf16.mxu0 %v2215_v0 }
 0x174   : > { %1943 = vmatprep.subr.bf16.mxu1 %v2215_v0 }
 0x176   : > { %1933 = vmatpush3.bf16.msra.mxu0 %v2532_v27 }
 0x177   : > { %1945 = vmatpush3.bf16.msra.mxu1 %v2532_v27  ;;  %1946 = vmatprep.subr.bf16.mxu0 %v2215_v0 }
 0x178   : > { %1958 = vmatprep.subr.bf16.mxu1 %v2215_v0 }
 0x179   : > { %1803 = vmatmul.mubr.msk.f32.vlgmr.msra.gmra.mrb[6].mxu0 %vm542_vm2, %v991_v20 }
 0x17a   : > { %1822 = vmatmul.mubr.msk.f32.vlgmr.msra.gmra.mrb[6].mxu1 %vm542_vm2, %v1075_v22  ;;  %1948 = vmatpush3.bf16.msra.mxu0 %v2501_v19 }
 0x17b   : > { %1960 = vmatpush3.bf16.msra.mxu1 %v2501_v19  ;;  %1949 = vmatprep.subr.bf16.mxu0 %v2215_v0  ;;  %v2064_v19 = vpop.eup %2063 }
 0x17c   : > { %1961 = vmatprep.subr.bf16.mxu1 %v2215_v0  ;;  %1840 = vmatprep.mubr.msk.f32.mxu0 %vm2216_vm0, %v2217_v1 }
 0x17d   : > { %1859 = vmatprep.mubr.msk.f32.mxu1 %vm2216_vm0, %v2217_v1  ;;  %v1242_v1 = vadd.f32 1.0, %v2064_v19 }
 0x17e   : > { %1951 = vmatpush3.bf16.msra.mxu0 %v2508_v21 }
 0x17f   : > { %1963 = vmatpush3.bf16.msra.mxu1 %v2508_v21  ;;  %1952 = vmatprep.subr.bf16.mxu0 %v2215_v0  ;;  %v1239_v21 = vmul.f32 0.5, %v1238_v10 }
 0x180   : > { %1964 = vmatprep.subr.bf16.mxu1 %v2215_v0 }
 0x181   : > { %v1243_v29 = vmul.f32 %v1242_v1, %v1239_v21 }
 0x182   : > { %1954 = vmatpush3.bf16.msra.mxu0 %v2520_v24 }
 0x183   : > { %1966 = vmatpush3.bf16.msra.mxu1 %v2520_v24  ;;  %1955 = vmatprep.subr.bf16.mxu0 %v2215_v0 }
 0x184   : > { %1967 = vmatprep.subr.bf16.mxu1 %v2215_v0 }
 0x186   : > { %1957 = vmatpush3.bf16.msra.mxu0 %v2532_v27 }
 0x187   : > { %1969 = vmatpush3.bf16.msra.mxu1 %v2532_v27 }
 0x189   : > { %1841 = vmatmul.mubr.msk.f32.vlgmr.msra.gmra.mrb[8].mxu0 %vm542_vm2, %v1159_v28 }
 0x18a   : > { %1860 = vmatmul.mubr.msk.f32.vlgmr.msra.gmra.mrb[8].mxu1 %vm542_vm2, %v1243_v29 }
 0x22c   : > { %v725_v31 = vpop.f32.mrb[2].mxu0 }
 0x22d   : > { %v809_v24 = vpop.f32.mrb[2].mxu1  ;;  %v1728_v32 = vpop.f32.mrb[3].mxu0 }
 0x22e   : > { %1318 = vrot.lane.b32.xlu0 %v809_v24, %s2218_s27  ;;  %v1747_v33 = vpop.f32.mrb[3].mxu1  ;;  %s437_s27 = scalar_lea.vmem [#allocation10], %s2438_s21  ;;  %s1378_s21 = scalar_lea.sflag [#allocation7], %s2435_s17 }
 0x23c   : > { %v893_v0 = vpop.f32.mrb[4].mxu0 }
 0x23d   : > { %v977_v34 = vpop.f32.mrb[4].mxu1  ;;  %1322 = vrot.lane.b32.xlu0 %v893_v0, %s2219_s18  ;;  %v1766_v35 = vpop.f32.mrb[5].mxu0  ;;  %s1399_s18 = sshll.u32 %s437_s27, 4  ;;  %s2642_s18 = int_to_ptr.vmem [resolvable:$true] %s1399_s18 }
 0x23e   : > { %1326 = vrot.lane.b32.xlu1 %v977_v34, %s2220_s0  ;;  %v1785_v27 = vpop.f32.mrb[5].mxu1  ;;  %s2125_s29 = scalar_lea.vmem %s2642_s18, 128 }
 0x23f   : > { %p2126_p5 = scmp.ne.s32.totalorder %s2642_s18, %s2125_s29 }
 0x241   : > { %p2127_p4 = pnand %p2126_p5, %p2723_p7 }
 0x243   : > { %p2128_p10 = pneg %p2127_p4 }
 0x24c   : > { %v1061_v36 = vpop.f32.mrb[6].mxu0 }
 0x24d   : > { %v1145_v37 = vpop.f32.mrb[6].mxu1  ;;  %1330 = vrot.lane.b32.xlu1 %v1061_v36, %s2221_s28  ;;  %v1804_v38 = vpop.f32.mrb[7].mxu0 }
 0x24e   : > { %v1823_v39 = vpop.f32.mrb[7].mxu1  ;;  %1334 = vrot.lane.b32.xlu0 %v1145_v37, %s2222_s30  ;;  %s451_s30 = scalar_lea.vmem %s2699_s8, %s1581_s15 }
 0x25c   : > { %v1229_v40 = vpop.f32.mrb[8].mxu0 }
 0x25d   : > { %v1313_v41 = vpop.f32.mrb[8].mxu1  ;;  %1338 = vrot.lane.b32.xlu1 %v1229_v40, %s2223_s10  ;;  %v1842_v42 = vpop.f32.mrb[9].mxu0 }
 0x25e   : > { %v1861_v43 = vpop.f32.mrb[9].mxu1  ;;  %1342 = vrot.lane.b32.xlu0 %v1313_v41, %s2224_s22 }
 0x261   : > { %545 = vrot.lane.b32.xlu1 %v2543_v30, %s2225_s20  ;;  %s444_s20 = scalar_lea.vmem %s2698_s7, %s1581_s15  ;;  %s2227_s15 = smov [#allocation10]  }
 0x262   : > { %550 = vrot.lane.b32.xlu0 %v2543_v30, %s2226_s26  ;;  %s2129_s19 = sshll.u32 %s2227_s15, 4  ;;  %s2130_s19 = int_to_ptr.vmem [resolvable:$false] %s2129_s19 }
 0x263   : > { %s2131_s0 = scalar_lea.vmem %s2130_s19, 256  ;;  %p2132_p12 = scmp.lt.s32.totalorder %s2642_s18, %s2130_s19 }
 0x264   : > { %p2133_p1 = scmp.lt.s32.totalorder %s2131_s0, %s2125_s29 }
 0x266   : > { %p2134_p2 = por %p2133_p1, %p2132_p12 }
 0x268   : > { %p2135_p9 = pnand %p2134_p2, %p2128_p10 }
 0x2a0   : > { %v1319_v44 = vpop.permute.xlu0 %1318 }
 0x2a1   : > { %v1346_v47 = vsel %vm548_vm3, %v725_v31, %v1319_v44 }
 0x2af   : > { %v1323_v46 = vpop.permute.xlu0 %1322 }
 0x2b0   : > { %v1327_v45 = vpop.permute.xlu1 %1326  ;;  %v1348_v48 = vsel %vm1347_vm4, %v1346_v47, %v1323_v46 }
 0x2b1   : > { %v1350_v50 = vsel %vm1349_vm5, %v1348_v48, %v1327_v45 }
 0x2bf   : > { %v1331_v49 = vpop.permute.xlu1 %1330 }
 0x2c0   : > { %v1335_v51 = vpop.permute.xlu0 %1334  ;;  %v1352_v52 = vsel %vm1351_vm6, %v1350_v50, %v1331_v49 }
 0x2c1   : > { %v1354_v30 = vsel %vm1353_vm7, %v1352_v52, %v1335_v51 }
 0x2cf   : > { %v1339_v54 = vpop.permute.xlu1 %1338 }
 0x2d0   : > { %v1343_v55 = vpop.permute.xlu0 %1342  ;;  %v1356_v56 = vsel %vm1355_vm8, %v1354_v30, %v1339_v54 }
 0x2d1   : > { %v1358_v57 = vsel %vm1357_vm9, %v1356_v56, %v1343_v55 }
 0x2d2   : > { %v1360_v58 = vadd.f32 %v1359_v53, %v1358_v57 }
 0x2d3   : > { %v546_v59 = vpop.permute.xlu1 %545 }
 0x2d4   : > { %v551_v60 = vpop.permute.xlu0 %550  ;;  %549 = vst.msk [vmem:[%s444_s20] sm:$0xff] %vm548_vm3, %v546_v59 }
 0x2d5   : > { %1362 = vst.msk [vmem:[%s437_s27] sm:$0xff] %vm1361_vm10, %v1360_v58 }
 0x2d6   : > { %553 = vst.msk [vmem:[%s451_s30] sm:$0xff] %vm548_vm3, %v551_v60 }
 0x2d7   : > { %2138 = shalt.err (!%p2135_p9)
}
 0x2d8   : > { %s2139_s17 = scalar_lea.hbm %s2640_s14, 128  ;;  %s2143_s30 = scalar_lea.hbm %s2700_s9, 256 }
 0x2d9   : > { %p2140_p11 = scmp.ne.s32.totalorder %s2640_s14, %s2139_s17  ;;  %p2144_p13 = scmp.lt.u32.totalorder %s2640_s14, %s2700_s9 }
 0x2da   : > { %p2145_p8 = scmp.lt.u32.totalorder %s2143_s30, %s2139_s17  ;;  %p2147_p5 = scmp.lt.u32.totalorder %s2139_s17, %s2640_s14 }
 0x2db   : > { %p2141_p3 = pnand %p2140_p11, %p2723_p7 }
 0x2dc   : > { %p2146_p0 = por %p2145_p8, %p2144_p13 }
 0x2dd   : > { %p2142_p6 = pneg %p2141_p3 }
 0x2de   : > { %p2148_p4 = por %p2147_p5, %p2146_p0 }
 0x2e0   : > { %p2149_p10 = pnand %p2148_p4, %p2142_p6 }
 0x2e2   : > { %2152 = shalt.err (!%p2149_p10)
}
 0x2e3   : > { %1974 = dma.vmem_to_hbm [thread:$0]  (%p2723_p7), %s2642_s18, 128, %s2640_s14, %s1378_s21  }
 0x2e4 PF: > { %s1431_s20 = sand.u32 1, %s2191_s11   ;;  %p2724_p12 = scmp.ne.s32.totalorder %s2713_s25, 0 }
 0x2e5   : > { %p2725_p1 = scmp.ge.s32.totalorder %s2211_s16, 2  ;;  %s1432_s26 = scalar_lea.sflag [#allocation7], %s1431_s20 }
 0x2e7   : > { %p1984_p2 = pnand %p2725_p1, %p2724_p12 }
 0x2e9   : > { %2186 = dma.done.wait (!%p1984_p2), %s1432_s26, 128  }
 0x2ea   : > { %2188 = vsyncadd (!%p1984_p2), %s1432_s26, 4294967168  ;;  %s30_s16 = sadd.s32 1, %s2211_s16   ;;  %s2726_s14 = sld [smem:[#allocation14_spill]] }
 0x2eb   : > { %p27_p9 = scmp.ge.s32.totalorder %s30_s16, 4   ;;  %s2727_s15 = sld [smem:[#allocation15_spill]] }
 0x2ec   : > { %s2728_s11 = smov %s2195_s12  ;;  %s2729_s12 = smov %s2199_s13 }
 0x2ed   : > { %s2730_s13 = smov %s2337_s24  ;;  %29 = sbr.rel (!%p27_p9) target bundleno = 11 (0xb), region = 134 }
 0x2f4   :  { %1437 = vsyncpa [#allocation6], 1 }
 0x2f5   :  { %1439 = vsyncpa [#allocation6 + $0x1], 1 }
 0x2f6   :  { %1440 = vsyncpa [#allocation9], 1 }
 0x2f7   :  { %1442 = vsyncpa [#allocation9 + $0x1], 1 }
 0x2f8   :  { %1443 = vsyncpa [#allocation7], 1 }
 0x2f9   :  { %1445 = vsyncpa [#allocation7 + $0x1], 1 }

</bundles_post_ra>
